<compile_context>
chip_gen: v7x
topology: tpu7x:2x2x1
jax: 0.10.0
libtpu: 0.0.40
codegen_flags: <defaults>
</compile_context>

<pallas_src>
import math

import jax
import jax.numpy as jnp
from jax import lax
from jax.experimental import pallas as pl
from jax.experimental.pallas import tpu as pltpu

# ----------------------------- small GPT-2 config ----------------------------
VOCAB = 128
MAX_POS = 32
D_MODEL = 32          # hidden size (stands in for 768)
N_HEAD = 2
HEAD_DIM = D_MODEL // N_HEAD
N_LAYER = 2
D_FF = 4 * D_MODEL
N_CLASSES = 2         # nn.Linear(hidden, 2) head
HEAD_PAD = 128        # lane-dense padded width for the head output
LN_EPS = 1e-5
NEG_INF = -1e9
GELU_C = math.sqrt(2.0 / math.pi)


# ------------------------------- kernel helpers ------------------------------
def _layernorm(h, g, b):
    mu = jnp.mean(h, axis=-1, keepdims=True)
    var = jnp.mean(jnp.square(h - mu), axis=-1, keepdims=True)
    return (h - mu) * lax.rsqrt(var + LN_EPS) * g + b


def _gelu_new(x):
    # GPT-2 "gelu_new" (tanh approximation), f32 on the VPU/EUP
    return 0.5 * x * (1.0 + jnp.tanh(GELU_C * (x + 0.044715 * x * x * x)))


def _bf16(x):
    return x.astype(jnp.bfloat16)


# ------------------------- fused full-forward kernel -------------------------
def fused_forward_kernel(x_ref, mask_ref,
                         ln1g_ref, ln1b_ref, wqkv_ref, bqkv_ref, wo_ref, bo_ref,
                         ln2g_ref, ln2b_ref, wfc_ref, bfc_ref, wproj_ref, bproj_ref,
                         lnfg_ref, lnfb_ref, whead_ref, bhead_ref,
                         out_ref):
    B, S, D = x_ref.shape
    BS = B * S

    # residual stream as one (B*S, D) f32 slab
    x = x_ref[...].astype(jnp.float32).reshape(BS, D)

    # causal + key-padding bias, built ONCE, reused by every layer
    mask = mask_ref[...]                                    # (B, S), 1.0 keep / 0.0 pad
    row = lax.broadcasted_iota(jnp.int32, (S, S), 0)
    col = lax.broadcasted_iota(jnp.int32, (S, S), 1)
    keep = jnp.logical_and((col <= row)[None, :, :], (mask > 0.5)[:, None, :])
    att_bias = jnp.where(keep, 0.0, NEG_INF)                # (B, S, S) f32

    # static unroll over layers; all (tiny) weights stay resident in VMEM
    for li in range(N_LAYER):
        # ---- attention ----
        h = _layernorm(x, ln1g_ref[li], ln1b_ref[li])                            # (BS, D) f32
        # 1/sqrt(head_dim) is already folded into the Q columns of w_qkv.
        qkv = jnp.dot(_bf16(h), wqkv_ref[li],
                      preferred_element_type=jnp.float32) + bqkv_ref[li]         # (BS, 3D) f32
        wo_l = wo_ref[li]                                                        # (D, D) bf16
        attn = bo_ref[li]                                                        # (1, D) f32, broadcasts

        for hh in range(N_HEAD):
            lo, hi = hh * HEAD_DIM, (hh + 1) * HEAD_DIM
            q_h = qkv[:, lo:hi].reshape(B, S, HEAD_DIM)
            k_h = qkv[:, D + lo:D + hi].reshape(B, S, HEAD_DIM)
            v_h = qkv[:, 2 * D + lo:2 * D + hi].reshape(B, S, HEAD_DIM)

            s = jnp.einsum('bqd,bkd->bqk', _bf16(q_h), _bf16(k_h),
                           preferred_element_type=jnp.float32)                   # (B, S, S)
            s = s + att_bias
            s = s - jnp.max(s, axis=-1, keepdims=True)
            p = jnp.exp(s)
            p = p * pl.reciprocal(jnp.sum(p, axis=-1, keepdims=True), approx=True)

            ctx = jnp.einsum('bqk,bkd->bqd', _bf16(p), _bf16(v_h),
                             preferred_element_type=jnp.float32)                 # (B, S, hd)
            # fold this head's context straight into the output projection:
            # no lane concat, no (S,H,hd) transpose
            attn = attn + jnp.dot(_bf16(ctx.reshape(BS, HEAD_DIM)),
                                  wo_l[lo:hi, :],
                                  preferred_element_type=jnp.float32)            # (BS, D)
        x = x + attn

        # ---- MLP ----
        h2 = _layernorm(x, ln2g_ref[li], ln2b_ref[li])
        ff = _gelu_new(jnp.dot(_bf16(h2), wfc_ref[li],
                               preferred_element_type=jnp.float32) + bfc_ref[li])
        x = x + jnp.dot(_bf16(ff), wproj_ref[li],
                        preferred_element_type=jnp.float32) + bproj_ref[li]

    # ---- final LN on the LAST token + lane-dense padded linear head ----
    # NOTE: position S-1 matches the HF reference under left padding (as in the
    # reference usage with attention_mask).
    last = x.reshape(B, S, D)[:, S - 1:S, :].reshape(B, D)
    hl = _layernorm(last, lnfg_ref[...], lnfb_ref[...])
    logits = jnp.dot(_bf16(hl), whead_ref[...],
                     preferred_element_type=jnp.float32) + bhead_ref[...]        # (B, 128)
    out_ref[...] = logits.astype(out_ref.dtype)


# --------------------------------- full model ---------------------------------
def bandit_model_forward(params, input_ids, attention_mask, head_mask=None):
    # TODO(synk): head_mask (per-head attention masking) not implemented; the
    # reference usage passes None.
    B, S = input_ids.shape
    pos = jnp.arange(S)
    # Embedding gather is glue (XLA gather); heavy compute is in the fused kernel.
    x = (params['wte'][input_ids] + params['wpe'][pos][None, :, :]).astype(jnp.float32)
    mask = attention_mask.astype(jnp.float32)               # (B, S)

    sb = params['stacked_blocks']
    args = (x, mask,
            sb['ln1_g'], sb['ln1_b'], sb['w_qkv'], sb['b_qkv'], sb['w_o'], sb['b_o'],
            sb['ln2_g'], sb['ln2_b'], sb['w_fc'], sb['b_fc'], sb['w_proj'], sb['b_proj'],
            params['lnf_g'], params['lnf_b'],
            params['w_head_pad'], params['b_head_pad'])

    vmem = pl.BlockSpec(memory_space=pltpu.MemorySpace.VMEM)
    out = pl.pallas_call(
        fused_forward_kernel,
        out_shape=jax.ShapeDtypeStruct((B, HEAD_PAD), jnp.float32),
        in_specs=[vmem] * len(args),
        out_specs=vmem,
    )(*args)

    # slice the lane-dense padded logits down to the real (B, 2) head output
    return out[:, :N_CLASSES]


# ------------------------------ parameter init --------------------------------
def init_params(key):
    std = 0.02
    q_scale = 1.0 / math.sqrt(HEAD_DIM)
    keys = jax.random.split(key, 3 + N_LAYER)
    blocks = []
    for li in range(N_LAYER):
        k = jax.random.split(keys[3 + li], 4)
        w_qkv = jax.random.normal(k[0], (D_MODEL, 3 * D_MODEL), jnp.float32) * std
        b_qkv = jnp.zeros((1, 3 * D_MODEL), jnp.float32)
        # fold 1/sqrt(head_dim) into the Q columns (weight AND bias) at init
        w_qkv = w_qkv.at[:, :D_MODEL].multiply(q_scale)
        b_qkv = b_qkv.at[:, :D_MODEL].multiply(q_scale)
        blocks.append({
            'ln1_g': jnp.ones((1, D_MODEL), jnp.float32),
            'ln1_b': jnp.zeros((1, D_MODEL), jnp.float32),
            'w_qkv': w_qkv.astype(jnp.bfloat16),
            'b_qkv': b_qkv,
            'w_o': (jax.random.normal(k[1], (D_MODEL, D_MODEL), jnp.float32) * std
                    ).astype(jnp.bfloat16),
            'b_o': jnp.zeros((1, D_MODEL), jnp.float32),
            'ln2_g': jnp.ones((1, D_MODEL), jnp.float32),
            'ln2_b': jnp.zeros((1, D_MODEL), jnp.float32),
            'w_fc': (jax.random.normal(k[2], (D_MODEL, D_FF), jnp.float32) * std
                     ).astype(jnp.bfloat16),
            'b_fc': jnp.zeros((1, D_FF), jnp.float32),
            'w_proj': (jax.random.normal(k[3], (D_FF, D_MODEL), jnp.float32) * std
                       ).astype(jnp.bfloat16),
            'b_proj': jnp.zeros((1, D_MODEL), jnp.float32),
        })
    # stack per-layer weights so the fused kernel indexes them statically
    stacked = {name: jnp.stack([b[name] for b in blocks], axis=0) for name in blocks[0]}

    # nn.Linear(D, 2): stored transposed (D, 2) for x @ W + b, padded to 128
    # lanes so the kernel's output store is lane-dense (unmasked vst).
    w_head = jax.random.normal(keys[2], (D_MODEL, N_CLASSES), jnp.float32) * std
    w_head_pad = jnp.zeros((D_MODEL, HEAD_PAD), jnp.float32).at[:, :N_CLASSES].set(w_head)

    return {
        'wte': jax.random.normal(keys[0], (VOCAB, D_MODEL), jnp.float32) * std,
        'wpe': jax.random.normal(keys[1], (MAX_POS, D_MODEL), jnp.float32) * std,
        'lnf_g': jnp.ones((1, D_MODEL), jnp.float32),
        'lnf_b': jnp.zeros((1, D_MODEL), jnp.float32),
        'w_head_pad': w_head_pad.astype(jnp.bfloat16),
        'b_head_pad': jnp.zeros((1, HEAD_PAD), jnp.float32),
        'stacked_blocks': stacked,
    }


# ------------------------------------ main -------------------------------------
if __name__ == "__main__":
    key = jax.random.PRNGKey(0)
    k_param, k_ids = jax.random.split(key)

    params = init_params(k_param)

    B, S = 2, 8
    input_ids = jax.random.randint(k_ids, (B, S), 0, VOCAB, dtype=jnp.int32)
    # typical left-padded attention mask: first two tokens of batch 1 masked
    attention_mask = jnp.array(
        [[1, 1, 1, 1, 1, 1, 1, 1],
         [0, 0, 1, 1, 1, 1, 1, 1]], dtype=jnp.int32)

    fwd = jax.jit(bandit_model_forward)
    out = fwd(params, input_ids, attention_mask)
    out = jax.block_until_ready(out)

    assert out.shape == (B, N_CLASSES), out.shape
    assert out.dtype == jnp.float32, out.dtype
    assert bool(jnp.all(jnp.isfinite(out)))
    print("KERNEL_OK")
</pallas_src>

<mosaic_0001>
module attributes {stable_mosaic.version = 11 : i64} {
  func.func @fused_forward_kernel(%arg0: memref<2x8x32xf32, #tpu.memory_space<vmem>>, %arg1: memref<2x8xf32, #tpu.memory_space<vmem>>, %arg2: memref<2x1x32xf32, #tpu.memory_space<vmem>>, %arg3: memref<2x1x32xf32, #tpu.memory_space<vmem>>, %arg4: memref<2x32x96xbf16, #tpu.memory_space<vmem>>, %arg5: memref<2x1x96xf32, #tpu.memory_space<vmem>>, %arg6: memref<2x32x32xbf16, #tpu.memory_space<vmem>>, %arg7: memref<2x1x32xf32, #tpu.memory_space<vmem>>, %arg8: memref<2x1x32xf32, #tpu.memory_space<vmem>>, %arg9: memref<2x1x32xf32, #tpu.memory_space<vmem>>, %arg10: memref<2x32x128xbf16, #tpu.memory_space<vmem>>, %arg11: memref<2x1x128xf32, #tpu.memory_space<vmem>>, %arg12: memref<2x128x32xbf16, #tpu.memory_space<vmem>>, %arg13: memref<2x1x32xf32, #tpu.memory_space<vmem>>, %arg14: memref<1x32xf32, #tpu.memory_space<vmem>>, %arg15: memref<1x32xf32, #tpu.memory_space<vmem>>, %arg16: memref<32x128xbf16, #tpu.memory_space<vmem>>, %arg17: memref<1x128xf32, #tpu.memory_space<vmem>>, %arg18: memref<2x128xf32, #tpu.memory_space<vmem>>) attributes {dimension_semantics = [], scalar_prefetch = 0 : i64, scratch_operands = 0 : i64, tpu.core_type = #tpu.core_type<tc>} {
    %c0 = arith.constant 0 : index
    %c0_0 = arith.constant 0 : index
    %c0_1 = arith.constant 0 : index
    %0 = vector.load %arg0[%c0, %c0_0, %c0_1] : memref<2x8x32xf32, #tpu.memory_space<vmem>>, vector<2x8x32xf32>
    %1 = vector.shape_cast %0 : vector<2x8x32xf32> to vector<16x32xf32>
    %c0_2 = arith.constant 0 : index
    %c0_3 = arith.constant 0 : index
    %2 = vector.load %arg1[%c0_2, %c0_3] : memref<2x8xf32, #tpu.memory_space<vmem>>, vector<2x8xf32>
    %3 = tpu.iota {dimensions = array<i32: 0>} : vector<8x8xi32>
    %4 = tpu.iota {dimensions = array<i32: 1>} : vector<8x8xi32>
    %5 = arith.cmpi sle, %4, %3 : vector<8x8xi32>
    %6 = vector.shape_cast %5 : vector<8x8xi1> to vector<1x8x8xi1>
    %cst = arith.constant 5.000000e-01 : f32
    %7 = vector.broadcast %cst : f32 to vector<2x8xf32>
    %8 = arith.cmpf ogt, %2, %7 : vector<2x8xf32>
    %9 = vector.shape_cast %8 : vector<2x8xi1> to vector<2x1x8xi1>
    %10 = vector.broadcast %6 : vector<1x8x8xi1> to vector<2x8x8xi1>
    %11 = vector.broadcast %9 : vector<2x1x8xi1> to vector<2x8x8xi1>
    %12 = arith.andi %10, %11 : vector<2x8x8xi1>
    %cst_4 = arith.constant 0.000000e+00 : f32
    %cst_5 = arith.constant -1.000000e+09 : f32
    %13 = vector.broadcast %cst_4 : f32 to vector<2x8x8xf32>
    %14 = vector.broadcast %cst_5 : f32 to vector<2x8x8xf32>
    %15 = arith.select %12, %13, %14 : vector<2x8x8xi1>, vector<2x8x8xf32>
    %c0_6 = arith.constant 0 : index
    %c0_7 = arith.constant 0 : index
    %c0_8 = arith.constant 0 : index
    %16 = vector.load %arg2[%c0_6, %c0_7, %c0_8] : memref<2x1x32xf32, #tpu.memory_space<vmem>>, vector<1x1x32xf32>
    %17 = vector.shape_cast %16 : vector<1x1x32xf32> to vector<1x32xf32>
    %c0_9 = arith.constant 0 : index
    %c0_10 = arith.constant 0 : index
    %c0_11 = arith.constant 0 : index
    %18 = vector.load %arg3[%c0_9, %c0_10, %c0_11] : memref<2x1x32xf32, #tpu.memory_space<vmem>>, vector<1x1x32xf32>
    %19 = vector.shape_cast %18 : vector<1x1x32xf32> to vector<1x32xf32>
    %cst_12 = arith.constant dense<0.000000e+00> : vector<16xf32>
    %20 = vector.multi_reduction <add>, %1, %cst_12 [1] : vector<16x32xf32> to vector<16xf32>
    %21 = vector.shape_cast %20 : vector<16xf32> to vector<16x1xf32>
    %cst_13 = arith.constant 3.200000e+01 : f32
    %22 = vector.broadcast %cst_13 : f32 to vector<16x1xf32>
    %23 = arith.divf %21, %22 : vector<16x1xf32>
    %24 = vector.broadcast %23 : vector<16x1xf32> to vector<16x32xf32>
    %25 = arith.subf %1, %24 : vector<16x32xf32>
    %26 = arith.mulf %25, %25 : vector<16x32xf32>
    %cst_14 = arith.constant dense<0.000000e+00> : vector<16xf32>
    %27 = vector.multi_reduction <add>, %26, %cst_14 [1] : vector<16x32xf32> to vector<16xf32>
    %28 = vector.shape_cast %27 : vector<16xf32> to vector<16x1xf32>
    %cst_15 = arith.constant 3.200000e+01 : f32
    %29 = vector.broadcast %cst_15 : f32 to vector<16x1xf32>
    %30 = arith.divf %28, %29 : vector<16x1xf32>
    %31 = vector.broadcast %23 : vector<16x1xf32> to vector<16x32xf32>
    %32 = arith.subf %1, %31 : vector<16x32xf32>
    %cst_16 = arith.constant 9.99999974E-6 : f32
    %33 = vector.broadcast %cst_16 : f32 to vector<16x1xf32>
    %34 = arith.addf %30, %33 : vector<16x1xf32>
    %35 = math.rsqrt %34 : vector<16x1xf32>
    %36 = vector.broadcast %35 : vector<16x1xf32> to vector<16x32xf32>
    %37 = arith.mulf %32, %36 : vector<16x32xf32>
    %38 = vector.broadcast %17 : vector<1x32xf32> to vector<16x32xf32>
    %39 = arith.mulf %37, %38 : vector<16x32xf32>
    %40 = vector.broadcast %19 : vector<1x32xf32> to vector<16x32xf32>
    %41 = arith.addf %39, %40 : vector<16x32xf32>
    %42 = arith.truncf %41 : vector<16x32xf32> to vector<16x32xbf16>
    %c0_17 = arith.constant 0 : index
    %c0_18 = arith.constant 0 : index
    %c0_19 = arith.constant 0 : index
    %43 = vector.load %arg4[%c0_17, %c0_18, %c0_19] : memref<2x32x96xbf16, #tpu.memory_space<vmem>>, vector<1x32x96xbf16>
    %44 = vector.shape_cast %43 : vector<1x32x96xbf16> to vector<32x96xbf16>
    %cst_20 = arith.constant dense<0.000000e+00> : vector<16x96xf32>
    %45 = tpu.matmul %42, %44, %cst_20 {dimension_numbers = #tpu.dot_dimension_numbers<[1], [0], [0], [1], [0, 0, 1, 1], [], []>} : vector<16x32xbf16>, vector<32x96xbf16>, vector<16x96xf32> -> vector<16x96xf32>
    %c0_21 = arith.constant 0 : index
    %c0_22 = arith.constant 0 : index
    %c0_23 = arith.constant 0 : index
    %46 = vector.load %arg5[%c0_21, %c0_22, %c0_23] : memref<2x1x96xf32, #tpu.memory_space<vmem>>, vector<1x1x96xf32>
    %47 = vector.shape_cast %46 : vector<1x1x96xf32> to vector<1x96xf32>
    %48 = vector.broadcast %47 : vector<1x96xf32> to vector<16x96xf32>
    %49 = arith.addf %45, %48 : vector<16x96xf32>
    %c0_24 = arith.constant 0 : index
    %c0_25 = arith.constant 0 : index
    %c0_26 = arith.constant 0 : index
    %50 = vector.load %arg6[%c0_24, %c0_25, %c0_26] : memref<2x32x32xbf16, #tpu.memory_space<vmem>>, vector<1x32x32xbf16>
    %51 = vector.shape_cast %50 : vector<1x32x32xbf16> to vector<32x32xbf16>
    %c0_27 = arith.constant 0 : index
    %c0_28 = arith.constant 0 : index
    %c0_29 = arith.constant 0 : index
    %52 = vector.load %arg7[%c0_27, %c0_28, %c0_29] : memref<2x1x32xf32, #tpu.memory_space<vmem>>, vector<1x1x32xf32>
    %53 = vector.shape_cast %52 : vector<1x1x32xf32> to vector<1x32xf32>
    %54 = vector.extract_strided_slice %49 {offsets = [0, 0], sizes = [16, 16], strides = [1, 1]} : vector<16x96xf32> to vector<16x16xf32>
    %55 = vector.shape_cast %54 : vector<16x16xf32> to vector<2x8x16xf32>
    %56 = vector.extract_strided_slice %49 {offsets = [0, 32], sizes = [16, 16], strides = [1, 1]} : vector<16x96xf32> to vector<16x16xf32>
    %57 = vector.shape_cast %56 : vector<16x16xf32> to vector<2x8x16xf32>
    %58 = vector.extract_strided_slice %49 {offsets = [0, 64], sizes = [16, 16], strides = [1, 1]} : vector<16x96xf32> to vector<16x16xf32>
    %59 = vector.shape_cast %58 : vector<16x16xf32> to vector<2x8x16xf32>
    %60 = arith.truncf %55 : vector<2x8x16xf32> to vector<2x8x16xbf16>
    %61 = arith.truncf %57 : vector<2x8x16xf32> to vector<2x8x16xbf16>
    "tpu.trace_start"() <{level = 10 : i32, message = "bqd,bkd->bqk"}> : () -> ()
    %cst_30 = arith.constant dense<0.000000e+00> : vector<2x8x8xf32>
    %62 = tpu.matmul %60, %61, %cst_30 {dimension_numbers = #tpu.dot_dimension_numbers<[2], [2], [1], [1], [0, 0, 0, 1, 1, 1], [0], [0]>} : vector<2x8x16xbf16>, vector<2x8x16xbf16>, vector<2x8x8xf32> -> vector<2x8x8xf32>
    "tpu.trace_stop"() : () -> ()
    %63 = arith.addf %62, %15 : vector<2x8x8xf32>
    %cst_31 = arith.constant dense<0xFF800000> : vector<2x8xf32>
    %64 = vector.multi_reduction <maximumf>, %63, %cst_31 [2] : vector<2x8x8xf32> to vector<2x8xf32>
    %65 = vector.shape_cast %64 : vector<2x8xf32> to vector<2x8x1xf32>
    %66 = vector.broadcast %65 : vector<2x8x1xf32> to vector<2x8x8xf32>
    %67 = arith.subf %63, %66 : vector<2x8x8xf32>
    %68 = math.exp %67 : vector<2x8x8xf32>
    %cst_32 = arith.constant dense<0.000000e+00> : vector<2x8xf32>
    %69 = vector.multi_reduction <add>, %68, %cst_32 [2] : vector<2x8x8xf32> to vector<2x8xf32>
    %70 = vector.shape_cast %69 : vector<2x8xf32> to vector<2x8x1xf32>
    %71 = tpu.reciprocal %70 {approx = true} : vector<2x8x1xf32> -> vector<2x8x1xf32>
    %72 = vector.broadcast %71 : vector<2x8x1xf32> to vector<2x8x8xf32>
    %73 = arith.mulf %68, %72 : vector<2x8x8xf32>
    %74 = arith.truncf %73 : vector<2x8x8xf32> to vector<2x8x8xbf16>
    %75 = arith.truncf %59 : vector<2x8x16xf32> to vector<2x8x16xbf16>
    "tpu.trace_start"() <{level = 10 : i32, message = "bqk,bkd->bqd"}> : () -> ()
    %cst_33 = arith.constant dense<0.000000e+00> : vector<2x8x16xf32>
    %76 = tpu.matmul %74, %75, %cst_33 {dimension_numbers = #tpu.dot_dimension_numbers<[2], [1], [1], [2], [0, 0, 0, 1, 1, 2], [0], [0]>} : vector<2x8x8xbf16>, vector<2x8x16xbf16>, vector<2x8x16xf32> -> vector<2x8x16xf32>
    "tpu.trace_stop"() : () -> ()
    %77 = vector.shape_cast %76 : vector<2x8x16xf32> to vector<16x16xf32>
    %78 = arith.truncf %77 : vector<16x16xf32> to vector<16x16xbf16>
    %79 = vector.extract_strided_slice %51 {offsets = [0, 0], sizes = [16, 32], strides = [1, 1]} : vector<32x32xbf16> to vector<16x32xbf16>
    %cst_34 = arith.constant dense<0.000000e+00> : vector<16x32xf32>
    %80 = tpu.matmul %78, %79, %cst_34 {dimension_numbers = #tpu.dot_dimension_numbers<[1], [0], [0], [1], [0, 0, 1, 1], [], []>} : vector<16x16xbf16>, vector<16x32xbf16>, vector<16x32xf32> -> vector<16x32xf32>
    %81 = vector.broadcast %53 : vector<1x32xf32> to vector<16x32xf32>
    %82 = arith.addf %81, %80 : vector<16x32xf32>
    %83 = vector.extract_strided_slice %49 {offsets = [0, 16], sizes = [16, 16], strides = [1, 1]} : vector<16x96xf32> to vector<16x16xf32>
    %84 = vector.shape_cast %83 : vector<16x16xf32> to vector<2x8x16xf32>
    %85 = vector.extract_strided_slice %49 {offsets = [0, 48], sizes = [16, 16], strides = [1, 1]} : vector<16x96xf32> to vector<16x16xf32>
    %86 = vector.shape_cast %85 : vector<16x16xf32> to vector<2x8x16xf32>
    %87 = vector.extract_strided_slice %49 {offsets = [0, 80], sizes = [16, 16], strides = [1, 1]} : vector<16x96xf32> to vector<16x16xf32>
    %88 = vector.shape_cast %87 : vector<16x16xf32> to vector<2x8x16xf32>
    %89 = arith.truncf %84 : vector<2x8x16xf32> to vector<2x8x16xbf16>
    %90 = arith.truncf %86 : vector<2x8x16xf32> to vector<2x8x16xbf16>
    "tpu.trace_start"() <{level = 10 : i32, message = "bqd,bkd->bqk"}> : () -> ()
    %cst_35 = arith.constant dense<0.000000e+00> : vector<2x8x8xf32>
    %91 = tpu.matmul %89, %90, %cst_35 {dimension_numbers = #tpu.dot_dimension_numbers<[2], [2], [1], [1], [0, 0, 0, 1, 1, 1], [0], [0]>} : vector<2x8x16xbf16>, vector<2x8x16xbf16>, vector<2x8x8xf32> -> vector<2x8x8xf32>
    "tpu.trace_stop"() : () -> ()
    %92 = arith.addf %91, %15 : vector<2x8x8xf32>
    %cst_36 = arith.constant dense<0xFF800000> : vector<2x8xf32>
    %93 = vector.multi_reduction <maximumf>, %92, %cst_36 [2] : vector<2x8x8xf32> to vector<2x8xf32>
    %94 = vector.shape_cast %93 : vector<2x8xf32> to vector<2x8x1xf32>
    %95 = vector.broadcast %94 : vector<2x8x1xf32> to vector<2x8x8xf32>
    %96 = arith.subf %92, %95 : vector<2x8x8xf32>
    %97 = math.exp %96 : vector<2x8x8xf32>
    %cst_37 = arith.constant dense<0.000000e+00> : vector<2x8xf32>
    %98 = vector.multi_reduction <add>, %97, %cst_37 [2] : vector<2x8x8xf32> to vector<2x8xf32>
    %99 = vector.shape_cast %98 : vector<2x8xf32> to vector<2x8x1xf32>
    %100 = tpu.reciprocal %99 {approx = true} : vector<2x8x1xf32> -> vector<2x8x1xf32>
    %101 = vector.broadcast %100 : vector<2x8x1xf32> to vector<2x8x8xf32>
    %102 = arith.mulf %97, %101 : vector<2x8x8xf32>
    %103 = arith.truncf %102 : vector<2x8x8xf32> to vector<2x8x8xbf16>
    %104 = arith.truncf %88 : vector<2x8x16xf32> to vector<2x8x16xbf16>
    "tpu.trace_start"() <{level = 10 : i32, message = "bqk,bkd->bqd"}> : () -> ()
    %cst_38 = arith.constant dense<0.000000e+00> : vector<2x8x16xf32>
    %105 = tpu.matmul %103, %104, %cst_38 {dimension_numbers = #tpu.dot_dimension_numbers<[2], [1], [1], [2], [0, 0, 0, 1, 1, 2], [0], [0]>} : vector<2x8x8xbf16>, vector<2x8x16xbf16>, vector<2x8x16xf32> -> vector<2x8x16xf32>
    "tpu.trace_stop"() : () -> ()
    %106 = vector.shape_cast %105 : vector<2x8x16xf32> to vector<16x16xf32>
    %107 = arith.truncf %106 : vector<16x16xf32> to vector<16x16xbf16>
    %108 = vector.extract_strided_slice %51 {offsets = [16, 0], sizes = [16, 32], strides = [1, 1]} : vector<32x32xbf16> to vector<16x32xbf16>
    %cst_39 = arith.constant dense<0.000000e+00> : vector<16x32xf32>
    %109 = tpu.matmul %107, %108, %cst_39 {dimension_numbers = #tpu.dot_dimension_numbers<[1], [0], [0], [1], [0, 0, 1, 1], [], []>} : vector<16x16xbf16>, vector<16x32xbf16>, vector<16x32xf32> -> vector<16x32xf32>
    %110 = arith.addf %82, %109 : vector<16x32xf32>
    %111 = arith.addf %1, %110 : vector<16x32xf32>
    %c0_40 = arith.constant 0 : index
    %c0_41 = arith.constant 0 : index
    %c0_42 = arith.constant 0 : index
    %112 = vector.load %arg8[%c0_40, %c0_41, %c0_42] : memref<2x1x32xf32, #tpu.memory_space<vmem>>, vector<1x1x32xf32>
    %113 = vector.shape_cast %112 : vector<1x1x32xf32> to vector<1x32xf32>
    %c0_43 = arith.constant 0 : index
    %c0_44 = arith.constant 0 : index
    %c0_45 = arith.constant 0 : index
    %114 = vector.load %arg9[%c0_43, %c0_44, %c0_45] : memref<2x1x32xf32, #tpu.memory_space<vmem>>, vector<1x1x32xf32>
    %115 = vector.shape_cast %114 : vector<1x1x32xf32> to vector<1x32xf32>
    %cst_46 = arith.constant dense<0.000000e+00> : vector<16xf32>
    %116 = vector.multi_reduction <add>, %111, %cst_46 [1] : vector<16x32xf32> to vector<16xf32>
    %117 = vector.shape_cast %116 : vector<16xf32> to vector<16x1xf32>
    %cst_47 = arith.constant 3.200000e+01 : f32
    %118 = vector.broadcast %cst_47 : f32 to vector<16x1xf32>
    %119 = arith.divf %117, %118 : vector<16x1xf32>
    %120 = vector.broadcast %119 : vector<16x1xf32> to vector<16x32xf32>
    %121 = arith.subf %111, %120 : vector<16x32xf32>
    %122 = arith.mulf %121, %121 : vector<16x32xf32>
    %cst_48 = arith.constant dense<0.000000e+00> : vector<16xf32>
    %123 = vector.multi_reduction <add>, %122, %cst_48 [1] : vector<16x32xf32> to vector<16xf32>
    %124 = vector.shape_cast %123 : vector<16xf32> to vector<16x1xf32>
    %cst_49 = arith.constant 3.200000e+01 : f32
    %125 = vector.broadcast %cst_49 : f32 to vector<16x1xf32>
    %126 = arith.divf %124, %125 : vector<16x1xf32>
    %127 = vector.broadcast %119 : vector<16x1xf32> to vector<16x32xf32>
    %128 = arith.subf %111, %127 : vector<16x32xf32>
    %cst_50 = arith.constant 9.99999974E-6 : f32
    %129 = vector.broadcast %cst_50 : f32 to vector<16x1xf32>
    %130 = arith.addf %126, %129 : vector<16x1xf32>
    %131 = math.rsqrt %130 : vector<16x1xf32>
    %132 = vector.broadcast %131 : vector<16x1xf32> to vector<16x32xf32>
    %133 = arith.mulf %128, %132 : vector<16x32xf32>
    %134 = vector.broadcast %113 : vector<1x32xf32> to vector<16x32xf32>
    %135 = arith.mulf %133, %134 : vector<16x32xf32>
    %136 = vector.broadcast %115 : vector<1x32xf32> to vector<16x32xf32>
    %137 = arith.addf %135, %136 : vector<16x32xf32>
    %138 = arith.truncf %137 : vector<16x32xf32> to vector<16x32xbf16>
    %c0_51 = arith.constant 0 : index
    %c0_52 = arith.constant 0 : index
    %c0_53 = arith.constant 0 : index
    %139 = vector.load %arg10[%c0_51, %c0_52, %c0_53] : memref<2x32x128xbf16, #tpu.memory_space<vmem>>, vector<1x32x128xbf16>
    %140 = vector.shape_cast %139 : vector<1x32x128xbf16> to vector<32x128xbf16>
    %cst_54 = arith.constant dense<0.000000e+00> : vector<16x128xf32>
    %141 = tpu.matmul %138, %140, %cst_54 {dimension_numbers = #tpu.dot_dimension_numbers<[1], [0], [0], [1], [0, 0, 1, 1], [], []>} : vector<16x32xbf16>, vector<32x128xbf16>, vector<16x128xf32> -> vector<16x128xf32>
    %c0_55 = arith.constant 0 : index
    %c0_56 = arith.constant 0 : index
    %c0_57 = arith.constant 0 : index
    %142 = vector.load %arg11[%c0_55, %c0_56, %c0_57] : memref<2x1x128xf32, #tpu.memory_space<vmem>>, vector<1x1x128xf32>
    %143 = vector.shape_cast %142 : vector<1x1x128xf32> to vector<1x128xf32>
    %144 = vector.broadcast %143 : vector<1x128xf32> to vector<16x128xf32>
    %145 = arith.addf %141, %144 : vector<16x128xf32>
    %cst_58 = arith.constant 5.000000e-01 : f32
    %146 = vector.broadcast %cst_58 : f32 to vector<16x128xf32>
    %147 = arith.mulf %146, %145 : vector<16x128xf32>
    %cst_59 = arith.constant 4.471500e-02 : f32
    %148 = vector.broadcast %cst_59 : f32 to vector<16x128xf32>
    %149 = arith.mulf %148, %145 : vector<16x128xf32>
    %150 = arith.mulf %149, %145 : vector<16x128xf32>
    %151 = arith.mulf %150, %145 : vector<16x128xf32>
    %152 = arith.addf %145, %151 : vector<16x128xf32>
    %cst_60 = arith.constant 0.797884583 : f32
    %153 = vector.broadcast %cst_60 : f32 to vector<16x128xf32>
    %154 = arith.mulf %153, %152 : vector<16x128xf32>
    %155 = math.tanh %154 : vector<16x128xf32>
    %cst_61 = arith.constant 1.000000e+00 : f32
    %156 = vector.broadcast %cst_61 : f32 to vector<16x128xf32>
    %157 = arith.addf %156, %155 : vector<16x128xf32>
    %158 = arith.mulf %147, %157 : vector<16x128xf32>
    %159 = arith.truncf %158 : vector<16x128xf32> to vector<16x128xbf16>
    %c0_62 = arith.constant 0 : index
    %c0_63 = arith.constant 0 : index
    %c0_64 = arith.constant 0 : index
    %160 = vector.load %arg12[%c0_62, %c0_63, %c0_64] : memref<2x128x32xbf16, #tpu.memory_space<vmem>>, vector<1x128x32xbf16>
    %161 = vector.shape_cast %160 : vector<1x128x32xbf16> to vector<128x32xbf16>
    %cst_65 = arith.constant dense<0.000000e+00> : vector<16x32xf32>
    %162 = tpu.matmul %159, %161, %cst_65 {dimension_numbers = #tpu.dot_dimension_numbers<[1], [0], [0], [1], [0, 0, 1, 1], [], []>} : vector<16x128xbf16>, vector<128x32xbf16>, vector<16x32xf32> -> vector<16x32xf32>
    %163 = arith.addf %111, %162 : vector<16x32xf32>
    %c0_66 = arith.constant 0 : index
    %c0_67 = arith.constant 0 : index
    %c0_68 = arith.constant 0 : index
    %164 = vector.load %arg13[%c0_66, %c0_67, %c0_68] : memref<2x1x32xf32, #tpu.memory_space<vmem>>, vector<1x1x32xf32>
    %165 = vector.shape_cast %164 : vector<1x1x32xf32> to vector<1x32xf32>
    %166 = vector.broadcast %165 : vector<1x32xf32> to vector<16x32xf32>
    %167 = arith.addf %163, %166 : vector<16x32xf32>
    %c1 = arith.constant 1 : index
    %c0_69 = arith.constant 0 : index
    %c0_70 = arith.constant 0 : index
    %168 = vector.load %arg2[%c1, %c0_69, %c0_70] : memref<2x1x32xf32, #tpu.memory_space<vmem>>, vector<1x1x32xf32>
    %169 = vector.shape_cast %168 : vector<1x1x32xf32> to vector<1x32xf32>
    %c1_71 = arith.constant 1 : index
    %c0_72 = arith.constant 0 : index
    %c0_73 = arith.constant 0 : index
    %170 = vector.load %arg3[%c1_71, %c0_72, %c0_73] : memref<2x1x32xf32, #tpu.memory_space<vmem>>, vector<1x1x32xf32>
    %171 = vector.shape_cast %170 : vector<1x1x32xf32> to vector<1x32xf32>
    %cst_74 = arith.constant dense<0.000000e+00> : vector<16xf32>
    %172 = vector.multi_reduction <add>, %167, %cst_74 [1] : vector<16x32xf32> to vector<16xf32>
    %173 = vector.shape_cast %172 : vector<16xf32> to vector<16x1xf32>
    %cst_75 = arith.constant 3.200000e+01 : f32
    %174 = vector.broadcast %cst_75 : f32 to vector<16x1xf32>
    %175 = arith.divf %173, %174 : vector<16x1xf32>
    %176 = vector.broadcast %175 : vector<16x1xf32> to vector<16x32xf32>
    %177 = arith.subf %167, %176 : vector<16x32xf32>
    %178 = arith.mulf %177, %177 : vector<16x32xf32>
    %cst_76 = arith.constant dense<0.000000e+00> : vector<16xf32>
    %179 = vector.multi_reduction <add>, %178, %cst_76 [1] : vector<16x32xf32> to vector<16xf32>
    %180 = vector.shape_cast %179 : vector<16xf32> to vector<16x1xf32>
    %cst_77 = arith.constant 3.200000e+01 : f32
    %181 = vector.broadcast %cst_77 : f32 to vector<16x1xf32>
    %182 = arith.divf %180, %181 : vector<16x1xf32>
    %183 = vector.broadcast %175 : vector<16x1xf32> to vector<16x32xf32>
    %184 = arith.subf %167, %183 : vector<16x32xf32>
    %cst_78 = arith.constant 9.99999974E-6 : f32
    %185 = vector.broadcast %cst_78 : f32 to vector<16x1xf32>
    %186 = arith.addf %182, %185 : vector<16x1xf32>
    %187 = math.rsqrt %186 : vector<16x1xf32>
    %188 = vector.broadcast %187 : vector<16x1xf32> to vector<16x32xf32>
    %189 = arith.mulf %184, %188 : vector<16x32xf32>
    %190 = vector.broadcast %169 : vector<1x32xf32> to vector<16x32xf32>
    %191 = arith.mulf %189, %190 : vector<16x32xf32>
    %192 = vector.broadcast %171 : vector<1x32xf32> to vector<16x32xf32>
    %193 = arith.addf %191, %192 : vector<16x32xf32>
    %194 = arith.truncf %193 : vector<16x32xf32> to vector<16x32xbf16>
    %c1_79 = arith.constant 1 : index
    %c0_80 = arith.constant 0 : index
    %c0_81 = arith.constant 0 : index
    %195 = vector.load %arg4[%c1_79, %c0_80, %c0_81] : memref<2x32x96xbf16, #tpu.memory_space<vmem>>, vector<1x32x96xbf16>
    %196 = vector.shape_cast %195 : vector<1x32x96xbf16> to vector<32x96xbf16>
    %cst_82 = arith.constant dense<0.000000e+00> : vector<16x96xf32>
    %197 = tpu.matmul %194, %196, %cst_82 {dimension_numbers = #tpu.dot_dimension_numbers<[1], [0], [0], [1], [0, 0, 1, 1], [], []>} : vector<16x32xbf16>, vector<32x96xbf16>, vector<16x96xf32> -> vector<16x96xf32>
    %c1_83 = arith.constant 1 : index
    %c0_84 = arith.constant 0 : index
    %c0_85 = arith.constant 0 : index
    %198 = vector.load %arg5[%c1_83, %c0_84, %c0_85] : memref<2x1x96xf32, #tpu.memory_space<vmem>>, vector<1x1x96xf32>
    %199 = vector.shape_cast %198 : vector<1x1x96xf32> to vector<1x96xf32>
    %200 = vector.broadcast %199 : vector<1x96xf32> to vector<16x96xf32>
    %201 = arith.addf %197, %200 : vector<16x96xf32>
    %c1_86 = arith.constant 1 : index
    %c0_87 = arith.constant 0 : index
    %c0_88 = arith.constant 0 : index
    %202 = vector.load %arg6[%c1_86, %c0_87, %c0_88] : memref<2x32x32xbf16, #tpu.memory_space<vmem>>, vector<1x32x32xbf16>
    %203 = vector.shape_cast %202 : vector<1x32x32xbf16> to vector<32x32xbf16>
    %c1_89 = arith.constant 1 : index
    %c0_90 = arith.constant 0 : index
    %c0_91 = arith.constant 0 : index
    %204 = vector.load %arg7[%c1_89, %c0_90, %c0_91] : memref<2x1x32xf32, #tpu.memory_space<vmem>>, vector<1x1x32xf32>
    %205 = vector.shape_cast %204 : vector<1x1x32xf32> to vector<1x32xf32>
    %206 = vector.extract_strided_slice %201 {offsets = [0, 0], sizes = [16, 16], strides = [1, 1]} : vector<16x96xf32> to vector<16x16xf32>
    %207 = vector.shape_cast %206 : vector<16x16xf32> to vector<2x8x16xf32>
    %208 = vector.extract_strided_slice %201 {offsets = [0, 32], sizes = [16, 16], strides = [1, 1]} : vector<16x96xf32> to vector<16x16xf32>
    %209 = vector.shape_cast %208 : vector<16x16xf32> to vector<2x8x16xf32>
    %210 = vector.extract_strided_slice %201 {offsets = [0, 64], sizes = [16, 16], strides = [1, 1]} : vector<16x96xf32> to vector<16x16xf32>
    %211 = vector.shape_cast %210 : vector<16x16xf32> to vector<2x8x16xf32>
    %212 = arith.truncf %207 : vector<2x8x16xf32> to vector<2x8x16xbf16>
    %213 = arith.truncf %209 : vector<2x8x16xf32> to vector<2x8x16xbf16>
    "tpu.trace_start"() <{level = 10 : i32, message = "bqd,bkd->bqk"}> : () -> ()
    %cst_92 = arith.constant dense<0.000000e+00> : vector<2x8x8xf32>
    %214 = tpu.matmul %212, %213, %cst_92 {dimension_numbers = #tpu.dot_dimension_numbers<[2], [2], [1], [1], [0, 0, 0, 1, 1, 1], [0], [0]>} : vector<2x8x16xbf16>, vector<2x8x16xbf16>, vector<2x8x8xf32> -> vector<2x8x8xf32>
    "tpu.trace_stop"() : () -> ()
    %215 = arith.addf %214, %15 : vector<2x8x8xf32>
    %cst_93 = arith.constant dense<0xFF800000> : vector<2x8xf32>
    %216 = vector.multi_reduction <maximumf>, %215, %cst_93 [2] : vector<2x8x8xf32> to vector<2x8xf32>
    %217 = vector.shape_cast %216 : vector<2x8xf32> to vector<2x8x1xf32>
    %218 = vector.broadcast %217 : vector<2x8x1xf32> to vector<2x8x8xf32>
    %219 = arith.subf %215, %218 : vector<2x8x8xf32>
    %220 = math.exp %219 : vector<2x8x8xf32>
    %cst_94 = arith.constant dense<0.000000e+00> : vector<2x8xf32>
    %221 = vector.multi_reduction <add>, %220, %cst_94 [2] : vector<2x8x8xf32> to vector<2x8xf32>
    %222 = vector.shape_cast %221 : vector<2x8xf32> to vector<2x8x1xf32>
    %223 = tpu.reciprocal %222 {approx = true} : vector<2x8x1xf32> -> vector<2x8x1xf32>
    %224 = vector.broadcast %223 : vector<2x8x1xf32> to vector<2x8x8xf32>
    %225 = arith.mulf %220, %224 : vector<2x8x8xf32>
    %226 = arith.truncf %225 : vector<2x8x8xf32> to vector<2x8x8xbf16>
    %227 = arith.truncf %211 : vector<2x8x16xf32> to vector<2x8x16xbf16>
    "tpu.trace_start"() <{level = 10 : i32, message = "bqk,bkd->bqd"}> : () -> ()
    %cst_95 = arith.constant dense<0.000000e+00> : vector<2x8x16xf32>
    %228 = tpu.matmul %226, %227, %cst_95 {dimension_numbers = #tpu.dot_dimension_numbers<[2], [1], [1], [2], [0, 0, 0, 1, 1, 2], [0], [0]>} : vector<2x8x8xbf16>, vector<2x8x16xbf16>, vector<2x8x16xf32> -> vector<2x8x16xf32>
    "tpu.trace_stop"() : () -> ()
    %229 = vector.shape_cast %228 : vector<2x8x16xf32> to vector<16x16xf32>
    %230 = arith.truncf %229 : vector<16x16xf32> to vector<16x16xbf16>
    %231 = vector.extract_strided_slice %203 {offsets = [0, 0], sizes = [16, 32], strides = [1, 1]} : vector<32x32xbf16> to vector<16x32xbf16>
    %cst_96 = arith.constant dense<0.000000e+00> : vector<16x32xf32>
    %232 = tpu.matmul %230, %231, %cst_96 {dimension_numbers = #tpu.dot_dimension_numbers<[1], [0], [0], [1], [0, 0, 1, 1], [], []>} : vector<16x16xbf16>, vector<16x32xbf16>, vector<16x32xf32> -> vector<16x32xf32>
    %233 = vector.broadcast %205 : vector<1x32xf32> to vector<16x32xf32>
    %234 = arith.addf %233, %232 : vector<16x32xf32>
    %235 = vector.extract_strided_slice %201 {offsets = [0, 16], sizes = [16, 16], strides = [1, 1]} : vector<16x96xf32> to vector<16x16xf32>
    %236 = vector.shape_cast %235 : vector<16x16xf32> to vector<2x8x16xf32>
    %237 = vector.extract_strided_slice %201 {offsets = [0, 48], sizes = [16, 16], strides = [1, 1]} : vector<16x96xf32> to vector<16x16xf32>
    %238 = vector.shape_cast %237 : vector<16x16xf32> to vector<2x8x16xf32>
    %239 = vector.extract_strided_slice %201 {offsets = [0, 80], sizes = [16, 16], strides = [1, 1]} : vector<16x96xf32> to vector<16x16xf32>
    %240 = vector.shape_cast %239 : vector<16x16xf32> to vector<2x8x16xf32>
    %241 = arith.truncf %236 : vector<2x8x16xf32> to vector<2x8x16xbf16>
    %242 = arith.truncf %238 : vector<2x8x16xf32> to vector<2x8x16xbf16>
    "tpu.trace_start"() <{level = 10 : i32, message = "bqd,bkd->bqk"}> : () -> ()
    %cst_97 = arith.constant dense<0.000000e+00> : vector<2x8x8xf32>
    %243 = tpu.matmul %241, %242, %cst_97 {dimension_numbers = #tpu.dot_dimension_numbers<[2], [2], [1], [1], [0, 0, 0, 1, 1, 1], [0], [0]>} : vector<2x8x16xbf16>, vector<2x8x16xbf16>, vector<2x8x8xf32> -> vector<2x8x8xf32>
    "tpu.trace_stop"() : () -> ()
    %244 = arith.addf %243, %15 : vector<2x8x8xf32>
    %cst_98 = arith.constant dense<0xFF800000> : vector<2x8xf32>
    %245 = vector.multi_reduction <maximumf>, %244, %cst_98 [2] : vector<2x8x8xf32> to vector<2x8xf32>
    %246 = vector.shape_cast %245 : vector<2x8xf32> to vector<2x8x1xf32>
    %247 = vector.broadcast %246 : vector<2x8x1xf32> to vector<2x8x8xf32>
    %248 = arith.subf %244, %247 : vector<2x8x8xf32>
    %249 = math.exp %248 : vector<2x8x8xf32>
    %cst_99 = arith.constant dense<0.000000e+00> : vector<2x8xf32>
    %250 = vector.multi_reduction <add>, %249, %cst_99 [2] : vector<2x8x8xf32> to vector<2x8xf32>
    %251 = vector.shape_cast %250 : vector<2x8xf32> to vector<2x8x1xf32>
    %252 = tpu.reciprocal %251 {approx = true} : vector<2x8x1xf32> -> vector<2x8x1xf32>
    %253 = vector.broadcast %252 : vector<2x8x1xf32> to vector<2x8x8xf32>
    %254 = arith.mulf %249, %253 : vector<2x8x8xf32>
    %255 = arith.truncf %254 : vector<2x8x8xf32> to vector<2x8x8xbf16>
    %256 = arith.truncf %240 : vector<2x8x16xf32> to vector<2x8x16xbf16>
    "tpu.trace_start"() <{level = 10 : i32, message = "bqk,bkd->bqd"}> : () -> ()
    %cst_100 = arith.constant dense<0.000000e+00> : vector<2x8x16xf32>
    %257 = tpu.matmul %255, %256, %cst_100 {dimension_numbers = #tpu.dot_dimension_numbers<[2], [1], [1], [2], [0, 0, 0, 1, 1, 2], [0], [0]>} : vector<2x8x8xbf16>, vector<2x8x16xbf16>, vector<2x8x16xf32> -> vector<2x8x16xf32>
    "tpu.trace_stop"() : () -> ()
    %258 = vector.shape_cast %257 : vector<2x8x16xf32> to vector<16x16xf32>
    %259 = arith.truncf %258 : vector<16x16xf32> to vector<16x16xbf16>
    %260 = vector.extract_strided_slice %203 {offsets = [16, 0], sizes = [16, 32], strides = [1, 1]} : vector<32x32xbf16> to vector<16x32xbf16>
    %cst_101 = arith.constant dense<0.000000e+00> : vector<16x32xf32>
    %261 = tpu.matmul %259, %260, %cst_101 {dimension_numbers = #tpu.dot_dimension_numbers<[1], [0], [0], [1], [0, 0, 1, 1], [], []>} : vector<16x16xbf16>, vector<16x32xbf16>, vector<16x32xf32> -> vector<16x32xf32>
    %262 = arith.addf %234, %261 : vector<16x32xf32>
    %263 = arith.addf %167, %262 : vector<16x32xf32>
    %c1_102 = arith.constant 1 : index
    %c0_103 = arith.constant 0 : index
    %c0_104 = arith.constant 0 : index
    %264 = vector.load %arg8[%c1_102, %c0_103, %c0_104] : memref<2x1x32xf32, #tpu.memory_space<vmem>>, vector<1x1x32xf32>
    %265 = vector.shape_cast %264 : vector<1x1x32xf32> to vector<1x32xf32>
    %c1_105 = arith.constant 1 : index
    %c0_106 = arith.constant 0 : index
    %c0_107 = arith.constant 0 : index
    %266 = vector.load %arg9[%c1_105, %c0_106, %c0_107] : memref<2x1x32xf32, #tpu.memory_space<vmem>>, vector<1x1x32xf32>
    %267 = vector.shape_cast %266 : vector<1x1x32xf32> to vector<1x32xf32>
    %cst_108 = arith.constant dense<0.000000e+00> : vector<16xf32>
    %268 = vector.multi_reduction <add>, %263, %cst_108 [1] : vector<16x32xf32> to vector<16xf32>
    %269 = vector.shape_cast %268 : vector<16xf32> to vector<16x1xf32>
    %cst_109 = arith.constant 3.200000e+01 : f32
    %270 = vector.broadcast %cst_109 : f32 to vector<16x1xf32>
    %271 = arith.divf %269, %270 : vector<16x1xf32>
    %272 = vector.broadcast %271 : vector<16x1xf32> to vector<16x32xf32>
    %273 = arith.subf %263, %272 : vector<16x32xf32>
    %274 = arith.mulf %273, %273 : vector<16x32xf32>
    %cst_110 = arith.constant dense<0.000000e+00> : vector<16xf32>
    %275 = vector.multi_reduction <add>, %274, %cst_110 [1] : vector<16x32xf32> to vector<16xf32>
    %276 = vector.shape_cast %275 : vector<16xf32> to vector<16x1xf32>
    %cst_111 = arith.constant 3.200000e+01 : f32
    %277 = vector.broadcast %cst_111 : f32 to vector<16x1xf32>
    %278 = arith.divf %276, %277 : vector<16x1xf32>
    %279 = vector.broadcast %271 : vector<16x1xf32> to vector<16x32xf32>
    %280 = arith.subf %263, %279 : vector<16x32xf32>
    %cst_112 = arith.constant 9.99999974E-6 : f32
    %281 = vector.broadcast %cst_112 : f32 to vector<16x1xf32>
    %282 = arith.addf %278, %281 : vector<16x1xf32>
    %283 = math.rsqrt %282 : vector<16x1xf32>
    %284 = vector.broadcast %283 : vector<16x1xf32> to vector<16x32xf32>
    %285 = arith.mulf %280, %284 : vector<16x32xf32>
    %286 = vector.broadcast %265 : vector<1x32xf32> to vector<16x32xf32>
    %287 = arith.mulf %285, %286 : vector<16x32xf32>
    %288 = vector.broadcast %267 : vector<1x32xf32> to vector<16x32xf32>
    %289 = arith.addf %287, %288 : vector<16x32xf32>
    %290 = arith.truncf %289 : vector<16x32xf32> to vector<16x32xbf16>
    %c1_113 = arith.constant 1 : index
    %c0_114 = arith.constant 0 : index
    %c0_115 = arith.constant 0 : index
    %291 = vector.load %arg10[%c1_113, %c0_114, %c0_115] : memref<2x32x128xbf16, #tpu.memory_space<vmem>>, vector<1x32x128xbf16>
    %292 = vector.shape_cast %291 : vector<1x32x128xbf16> to vector<32x128xbf16>
    %cst_116 = arith.constant dense<0.000000e+00> : vector<16x128xf32>
    %293 = tpu.matmul %290, %292, %cst_116 {dimension_numbers = #tpu.dot_dimension_numbers<[1], [0], [0], [1], [0, 0, 1, 1], [], []>} : vector<16x32xbf16>, vector<32x128xbf16>, vector<16x128xf32> -> vector<16x128xf32>
    %c1_117 = arith.constant 1 : index
    %c0_118 = arith.constant 0 : index
    %c0_119 = arith.constant 0 : index
    %294 = vector.load %arg11[%c1_117, %c0_118, %c0_119] : memref<2x1x128xf32, #tpu.memory_space<vmem>>, vector<1x1x128xf32>
    %295 = vector.shape_cast %294 : vector<1x1x128xf32> to vector<1x128xf32>
    %296 = vector.broadcast %295 : vector<1x128xf32> to vector<16x128xf32>
    %297 = arith.addf %293, %296 : vector<16x128xf32>
    %cst_120 = arith.constant 5.000000e-01 : f32
    %298 = vector.broadcast %cst_120 : f32 to vector<16x128xf32>
    %299 = arith.mulf %298, %297 : vector<16x128xf32>
    %cst_121 = arith.constant 4.471500e-02 : f32
    %300 = vector.broadcast %cst_121 : f32 to vector<16x128xf32>
    %301 = arith.mulf %300, %297 : vector<16x128xf32>
    %302 = arith.mulf %301, %297 : vector<16x128xf32>
    %303 = arith.mulf %302, %297 : vector<16x128xf32>
    %304 = arith.addf %297, %303 : vector<16x128xf32>
    %cst_122 = arith.constant 0.797884583 : f32
    %305 = vector.broadcast %cst_122 : f32 to vector<16x128xf32>
    %306 = arith.mulf %305, %304 : vector<16x128xf32>
    %307 = math.tanh %306 : vector<16x128xf32>
    %cst_123 = arith.constant 1.000000e+00 : f32
    %308 = vector.broadcast %cst_123 : f32 to vector<16x128xf32>
    %309 = arith.addf %308, %307 : vector<16x128xf32>
    %310 = arith.mulf %299, %309 : vector<16x128xf32>
    %311 = arith.truncf %310 : vector<16x128xf32> to vector<16x128xbf16>
    %c1_124 = arith.constant 1 : index
    %c0_125 = arith.constant 0 : index
    %c0_126 = arith.constant 0 : index
    %312 = vector.load %arg12[%c1_124, %c0_125, %c0_126] : memref<2x128x32xbf16, #tpu.memory_space<vmem>>, vector<1x128x32xbf16>
    %313 = vector.shape_cast %312 : vector<1x128x32xbf16> to vector<128x32xbf16>
    %cst_127 = arith.constant dense<0.000000e+00> : vector<16x32xf32>
    %314 = tpu.matmul %311, %313, %cst_127 {dimension_numbers = #tpu.dot_dimension_numbers<[1], [0], [0], [1], [0, 0, 1, 1], [], []>} : vector<16x128xbf16>, vector<128x32xbf16>, vector<16x32xf32> -> vector<16x32xf32>
    %315 = arith.addf %263, %314 : vector<16x32xf32>
    %c1_128 = arith.constant 1 : index
    %c0_129 = arith.constant 0 : index
    %c0_130 = arith.constant 0 : index
    %316 = vector.load %arg13[%c1_128, %c0_129, %c0_130] : memref<2x1x32xf32, #tpu.memory_space<vmem>>, vector<1x1x32xf32>
    %317 = vector.shape_cast %316 : vector<1x1x32xf32> to vector<1x32xf32>
    %318 = vector.broadcast %317 : vector<1x32xf32> to vector<16x32xf32>
    %319 = arith.addf %315, %318 : vector<16x32xf32>
    %320 = vector.shape_cast %319 : vector<16x32xf32> to vector<2x8x32xf32>
    %321 = vector.extract_strided_slice %320 {offsets = [0, 7, 0], sizes = [2, 1, 32], strides = [1, 1, 1]} : vector<2x8x32xf32> to vector<2x1x32xf32>
    %322 = vector.shape_cast %321 : vector<2x1x32xf32> to vector<2x32xf32>
    %c0_131 = arith.constant 0 : index
    %c0_132 = arith.constant 0 : index
    %323 = vector.load %arg14[%c0_131, %c0_132] : memref<1x32xf32, #tpu.memory_space<vmem>>, vector<1x32xf32>
    %c0_133 = arith.constant 0 : index
    %c0_134 = arith.constant 0 : index
    %324 = vector.load %arg15[%c0_133, %c0_134] : memref<1x32xf32, #tpu.memory_space<vmem>>, vector<1x32xf32>
    %cst_135 = arith.constant dense<0.000000e+00> : vector<2xf32>
    %325 = vector.multi_reduction <add>, %322, %cst_135 [1] : vector<2x32xf32> to vector<2xf32>
    %326 = vector.shape_cast %325 : vector<2xf32> to vector<2x1xf32>
    %cst_136 = arith.constant 3.200000e+01 : f32
    %327 = vector.broadcast %cst_136 : f32 to vector<2x1xf32>
    %328 = arith.divf %326, %327 : vector<2x1xf32>
    %329 = vector.broadcast %328 : vector<2x1xf32> to vector<2x32xf32>
    %330 = arith.subf %322, %329 : vector<2x32xf32>
    %331 = arith.mulf %330, %330 : vector<2x32xf32>
    %cst_137 = arith.constant dense<0.000000e+00> : vector<2xf32>
    %332 = vector.multi_reduction <add>, %331, %cst_137 [1] : vector<2x32xf32> to vector<2xf32>
    %333 = vector.shape_cast %332 : vector<2xf32> to vector<2x1xf32>
    %cst_138 = arith.constant 3.200000e+01 : f32
    %334 = vector.broadcast %cst_138 : f32 to vector<2x1xf32>
    %335 = arith.divf %333, %334 : vector<2x1xf32>
    %336 = vector.broadcast %328 : vector<2x1xf32> to vector<2x32xf32>
    %337 = arith.subf %322, %336 : vector<2x32xf32>
    %cst_139 = arith.constant 9.99999974E-6 : f32
    %338 = vector.broadcast %cst_139 : f32 to vector<2x1xf32>
    %339 = arith.addf %335, %338 : vector<2x1xf32>
    %340 = math.rsqrt %339 : vector<2x1xf32>
    %341 = vector.broadcast %340 : vector<2x1xf32> to vector<2x32xf32>
    %342 = arith.mulf %337, %341 : vector<2x32xf32>
    %343 = vector.broadcast %323 : vector<1x32xf32> to vector<2x32xf32>
    %344 = arith.mulf %342, %343 : vector<2x32xf32>
    %345 = vector.broadcast %324 : vector<1x32xf32> to vector<2x32xf32>
    %346 = arith.addf %344, %345 : vector<2x32xf32>
    %347 = arith.truncf %346 : vector<2x32xf32> to vector<2x32xbf16>
    %c0_140 = arith.constant 0 : index
    %c0_141 = arith.constant 0 : index
    %348 = vector.load %arg16[%c0_140, %c0_141] : memref<32x128xbf16, #tpu.memory_space<vmem>>, vector<32x128xbf16>
    %cst_142 = arith.constant dense<0.000000e+00> : vector<2x128xf32>
    %349 = tpu.matmul %347, %348, %cst_142 {dimension_numbers = #tpu.dot_dimension_numbers<[1], [0], [0], [1], [0, 0, 1, 1], [], []>} : vector<2x32xbf16>, vector<32x128xbf16>, vector<2x128xf32> -> vector<2x128xf32>
    %c0_143 = arith.constant 0 : index
    %c0_144 = arith.constant 0 : index
    %350 = vector.load %arg17[%c0_143, %c0_144] : memref<1x128xf32, #tpu.memory_space<vmem>>, vector<1x128xf32>
    %351 = vector.broadcast %350 : vector<1x128xf32> to vector<2x128xf32>
    %352 = arith.addf %349, %351 : vector<2x128xf32>
    %c0_145 = arith.constant 0 : index
    %c0_146 = arith.constant 0 : index
    %353 = vector.load %arg18[%c0_145, %c0_146] : memref<2x128xf32, #tpu.memory_space<vmem>>, vector<2x128xf32>
    tpu.vector_store %arg18[%c0_145, %c0_146], %352 {strides = array<i32>} : memref<2x128xf32, #tpu.memory_space<vmem>>, vector<2x128xf32>,
    return
  }
}

</mosaic_0001>

<bundles_post_ra>
// kernel: bandit_model_forward.1
= control target key start
LH: loop header
LB: loop body
LE: loop exit
PB: predicated region body
PF: predicated region fallthrough
CT: control target
= control target key end

     0   :  { %s3187_s0 = inlined_call_operand.vmem [shape: f32[2,8,32], index: 0, kind: input, shape index: {}]   ;;  %s3188_s1 = inlined_call_operand.vmem [shape: f32[2,8], index: 1, kind: input, shape index: {}]   ;;  %s3189_s2 = inlined_call_operand.vmem [shape: f32[2,1,32], index: 2, kind: input, shape index: {}]   ;;  %s3190_s3 = inlined_call_operand.vmem [shape: f32[2,1,32], index: 3, kind: input, shape index: {}]   ;;  %s3191_s4 = inlined_call_operand.vmem [shape: bf16[2,32,96], index: 4, kind: input, shape index: {}]   ;;  %s3192_s5 = inlined_call_operand.vmem [shape: f32[2,1,96], index: 5, kind: input, shape index: {}]   ;;  %s3193_s6 = inlined_call_operand.vmem [shape: bf16[2,32,32], index: 6, kind: input, shape index: {}]   ;;  %s3194_s7 = inlined_call_operand.vmem [shape: f32[2,1,32], index: 7, kind: input, shape index: {}]   ;;  %s3195_s8 = inlined_call_operand.vmem [shape: f32[2,1,32], index: 8, kind: input, shape index: {}]   ;;  %s3196_s9 = inlined_call_operand.vmem [shape: f32[2,1,32], index: 9, kind: input, shape index: {}]   ;;  %s3197_s10 = inlined_call_operand.vmem [shape: bf16[2,32,128], index: 10, kind: input, shape index: {}]   ;;  %s3198_s11 = inlined_call_operand.vmem [shape: f32[2,1,128], index: 11, kind: input, shape index: {}]   ;;  %s3199_s12 = inlined_call_operand.vmem [shape: bf16[2,128,32], index: 12, kind: input, shape index: {}]   ;;  %s3200_s13 = inlined_call_operand.vmem [shape: f32[2,1,32], index: 13, kind: input, shape index: {}]   ;;  %s3201_s14 = inlined_call_operand.vmem [shape: f32[1,32], index: 14, kind: input, shape index: {}]   ;;  %s3202_s15 = inlined_call_operand.vmem [shape: f32[1,32], index: 15, kind: input, shape index: {}]   ;;  %s3203_s16 = inlined_call_operand.vmem [shape: bf16[32,128], index: 16, kind: input, shape index: {}]   ;;  %s3204_s17 = inlined_call_operand.vmem [shape: f32[1,128], index: 17, kind: input, shape index: {}]   ;;  %s3205_s18 = inlined_call_operand.hbm [shape: f32[2,128], index: 18, kind: output, shape index: {}]  }
   0x1   :  { %3208 = sst [smem:[#allocation5_spill]] %s3187_s0 }
   0x2   :  { %3209 = sst [smem:[#allocation6_spill]] %s3188_s1 }
   0x3   :  { %3210 = sst [smem:[#allocation7_spill]] %s3189_s2 }
   0x4   :  { %s3211_s29 = sld [smem:[#allocation5_spill]]  ;;  %vm115_vm0 = vcmask 261120  }
   0xa   :  { %v2741_v0 = vld [vmem:[%s3211_s29] sm:$0xff]  ;;  %v2746_v1 = vld [vmem:[%s3211_s29 + $0x8] sm:$0xff] }
   0xb   :  { %v116_v2 = vsel %vm115_vm0, %v2741_v0, 0.0  ;;  %v119_v3 = vsel %vm115_vm0, %v2746_v1, 0.0 }
   0xc   :  { %117 = vadd.xlane.f32.xlu0 %v116_v2 }
  0x10   :  { %120 = vadd.xlane.f32.xlu0 %v119_v3 }
  0x11   :  { %23 = vsyncpa [#allocation3], 0  ;;  %v2518_v14 = vld [vmem:[%s3191_s4] sm:$0xff]   ;;  %v2632_v15 = vmov 0.0   ;;  %v2519_v16 = vld [vmem:[%s3191_s4 + $0x8] sm:$0xff]   ;;  %vm2633_vm1 = vmmov 0   ;;  %v64_v47 = vlaneseq }
  0x12   :  { %2307 = vmatprep.subr.bf16.mxu1 %v2632_v15  ;;  %2321 = vmatprep.subr.bf16.mxu0 %v2632_v15  ;;  %s3212_s23 = sld [smem:[#allocation7_spill]]  ;;  %v2125_v29 = vld [vmem:[%s3190_s3] ss:$0 sm:$0xff]  ;;  %s2634_s28 = smov 96   ;;  %vm237_vm2 = vcmask 130048   ;;  %v2636_v54 = vmov 0  }
  0x13   :  { %2308 = vmatpush3.bf16.msra.mxu1 %v2518_v14  ;;  %2311 = vmatprep.mubr.msk.bf16.mxu1 %vm2633_vm1, %v2632_v15  ;;  %v2126_v34 = vld [vmem:[%s3192_s5] ss:$0 sm:$0xff]  ;;  %v2635_v48 = vmov 1966171168   ;;  %s3213_s0 = sld [smem:[#allocation6_spill]]  ;;  %v65_v51 = vshrl.u32 %v64_v47, 7 }
  0x14   :  { %2309 = vmatprep.subr.bf16.mxu1 %v2632_v15  ;;  %2323 = vmatprep.mubr.msk.bf16.mxu0 %vm2633_vm1, %v2632_v15  ;;  %v72_v49 = vunpack.c.l.s4 %v2635_v48  ;;  %v67_v63 = vand.u32 127, %v64_v47  ;;  %vm333_vm11 = vcmask 64512   ;;  %s2638_s19 = smov 64   ;;  %s2639_s1 = smov 80   ;;  %vm363_vm12 = vcmask 1043456  }
  0x15   :  { %v101_v60 = vsub.s32 0, %v65_v51  ;;  %s2640_s20 = smov 112   ;;  %s2641_s2 = smov 48   ;;  %vm1973_vm13 = vcmask 261127   ;;  %vm1977_vm14 = vcmask 253952   ;;  %vm2051_vm15 = vcmask 1041409  }
  0x16   :  { %v73_v52 = vunpack.c.0.s8 %v72_v49  ;;  %vm68_vm6 = vcmp.le.s32.totalorder %v67_v63, %v65_v51 }
  0x17   :  { %2310 = vmatpush3.bf16.msra.mxu1 %v2519_v16 }
  0x18   :  { %2315 = vmatprep.subr.bf16.mxu1 %v2632_v15  ;;  %v2124_v25 = vld [vmem:[%s3212_s23] ss:$0 sm:$0xff]  ;;  %v76_v53 = vsub.s32 %v73_v52, %v65_v51 }
  0x19   :  { %v63_v50 = vld [vmem:[%s3213_s0] sm:$0x3] }
  0x1a   :  { %vm69_vm3 = vcmp.gt.f32.partialorder %v63_v50, 0.5 }
  0x1b   :  { %v70_v55 = vsel %vm69_vm3, 1, %v2636_v54 }
  0x1c   :  { %v77_v56 = vrot.slane %v70_v55, %v76_v53 }
  0x1e   :  { %v78_v57 = vcombine.high %v77_v56, %v77_v56  ;;  %v85_v58 = vrot.slane %v77_v56, %v76_v53 }
  0x20   :  { %v92_v59 = vrot.slane %v78_v57, %v76_v53  ;;  %vm93_vm4 = vcmp.ne.s32.totalorder %v85_v58, 0 }
  0x21   :  { %v97_v61 = vsel %vm93_vm4, 1, %v2636_v54 }
  0x22   :  { %vm94_vm5 = vcmp.ne.s32.totalorder %v92_v59, 0  ;;  %v102_v2 = vrot.slane %v97_v61, %v101_v60 }
  0x23   :  { %v98_v62 = vsel %vm94_vm5, 1, %v2636_v54 }
  0x24   :  { %v106_v3 = vrot.slane %v98_v62, %v101_v60  ;;  %vm107_vm7 = vcmp.eq.s32.totalorder %v102_v2, 1 }
  0x25   :  { %vm109_vm9 = vmand %vm68_vm6, %vm107_vm7 }
  0x26   :  { %vm108_vm8 = vcmp.eq.s32.totalorder %v106_v3, 1 }
  0x27   :  { %vm110_vm10 = vmand %vm68_vm6, %vm108_vm8 }
  0x99   :  { %v118_v4 = vpop.xlane.xlu0 %117 }
  0x9a   :  { %v123_v5 = vmul.f32 0.03125, %v118_v4  ;;  %v2637_v4 = vmov -1e+09  }
  0x9c   :  { %v125_v6 = vsub.f32 %v2741_v0, %v123_v5  ;;  %v2805_v5 = vsel %vm109_vm9, 0.0, %v2637_v4 }
  0x9d   :  { %v121_v7 = vpop.xlane.xlu0 %120 }
  0x9e   :  { %v124_v8 = vmul.f32 0.03125, %v121_v7  ;;  %v127_v9 = vmul.f32 %v125_v6, %v125_v6  ;;  %v2807_v7 = vsel %vm110_vm10, 0.0, %v2637_v4 }
  0xa0   :  { %v126_v10 = vsub.f32 %v2746_v1, %v124_v8  ;;  %v129_v11 = vsel %vm115_vm0, %v127_v9, 0.0 }
  0xa1   :  { %130 = vadd.xlane.f32.xlu1 %v129_v11 }
  0xa2   :  { %v128_v12 = vmul.f32 %v126_v10, %v126_v10 }
  0xa4   :  { %v132_v13 = vsel %vm115_vm0, %v128_v12, 0.0 }
  0xa5   :  { %133 = vadd.xlane.f32.xlu1 %v132_v13 }
 0x12e   :  { %v131_v17 = vpop.xlane.xlu1 %130 }
 0x12f   :  { %v135_v18 = vmul.f32 0.03125, %v131_v17 }
 0x131   :  { %v137_v19 = vadd.f32 1e-05, %v135_v18 }
 0x132   :  { %v134_v20 = vpop.xlane.xlu1 %133 }
 0x133   :  { %2548 = vrsqrt.f32 %v137_v19  ;;  %v136_v21 = vmul.f32 0.03125, %v134_v20 }
 0x135   :  { %v138_v22 = vadd.f32 1e-05, %v136_v21 }
 0x137   :  { %2550 = vrsqrt.f32 %v138_v22 }
 0x13d   :  { %v2549_v23 = vpop.eup %2548 }
 0x13e   :  { %v141_v24 = vmul.f32 %v2549_v23, %v125_v6 }
 0x140   :  { %v149_v28 = vmul.f32 %v2124_v25, %v141_v24 }
 0x141   :  { %v2551_v26 = vpop.eup %2550 }
 0x142   :  { %v142_v27 = vmul.f32 %v2551_v26, %v126_v10  ;;  %v157_v31 = vadd.f32 %v2125_v29, %v149_v28 }
 0x144   :  { %v150_v30 = vmul.f32 %v2124_v25, %v142_v27 }
 0x146   :  { %v158_v32 = vadd.f32 %v2125_v29, %v150_v30 }
 0x148   :  { %v159_v33 = vpack.c.bf16 %v158_v32, %v157_v31 }
 0x14a   :  { %2312 = vmatmul.mubr.msk.bf16.vlgmr.msra.gmra.mrb[0].mxu1 %vm115_vm0, %v159_v33 }
 0x14b   :  { %2317 = vmatprep.mubr.msk.bf16.mxu1 %vm2633_vm1, %v2632_v15 }
 0x21d   :  { %v220_v35 = vpop.f32.mrb[0].mxu1 }
 0x21e   :  { %v221_v36 = vadd.f32 %v2126_v34, %v220_v35  ;;  %v2313_v37 = vpop.f32.mrb[1].mxu1 }
 0x21f   :  { %v223_v38 = vpop.f32.mrb[2].mxu1 }
 0x220   :  { %v2782_v39 = vpack.c.bf16 %v221_v36, %v221_v36  ;;  %v224_v40 = vadd.f32 %v2126_v34, %v223_v38  ;;  %v2314_v41 = vpop.f32.mrb[3].mxu1 }
 0x222   :  { %v2784_v42 = vpack.c.bf16 %v224_v40, %v224_v40  ;;  %235 = vrot.lane.b32.xlu0 %v2782_v39, %s2634_s28  ;;  %v2520_v40 = vld [vmem:[%s3193_s6] sm:$0xff]  }
 0x224   :  { %285 = vrot.lane.b32.xlu1 %v2784_v42, %s2634_s28 }
 0x294   :  { %v236_v43 = vpop.permute.xlu0 %235 }
 0x295   :  { %v242_v44 = vsel %vm237_vm2, %v236_v43, 0 }
 0x296   :  { %2316 = vmatpush3.bf16.xpose.msra.mxu1 %v242_v44  ;;  %v286_v45 = vpop.permute.xlu1 %285 }
 0x297   :  { %v291_v46 = vsel %vm237_vm2, %v286_v45, 0  ;;  %2327 = vmatprep.subr.bf16.mxu1 %v2632_v15 }
 0x298   :  { %2322 = vmatpush3.bf16.xpose.msra.mxu0 %v291_v46 }
 0x299   :  { %2333 = vmatprep.subr.bf16.mxu0 %v2632_v15 }
 0x29d   :  { %2318 = vmatmul.mubr.msk.bf16.vlgmr.msra.gmra.mrb[4].mxu1 %vm237_vm2, %v2782_v39 }
 0x29e   :  { %2329 = vmatprep.mubr.msk.bf16.mxu1 %vm2633_vm1, %v2632_v15 }
 0x29f   :  { %2324 = vmatmul.mubr.msk.bf16.vlgmr.msra.gmra.mrb[0].mxu0 %vm237_vm2, %v2784_v42 }
 0x2a0   :  { %2335 = vmatprep.mubr.msk.bf16.mxu0 %vm2633_vm1, %v2632_v15 }
 0x370   :  { %v278_v6 = vpop.f32.mrb[4].mxu1 }
 0x371   :  { %v279_v8 = vadd.f32 %v278_v6, %v2805_v5  ;;  %v2319_v9 = vpop.f32.mrb[5].mxu1 }
 0x372   :  { %v281_v10 = vpop.f32.mrb[6].mxu1  ;;  %v327_v11 = vpop.f32.mrb[0].mxu0 }
 0x373   :  { %v328_v12 = vadd.f32 %v327_v11, %v2807_v7  ;;  %v2320_v13 = vpop.f32.mrb[7].mxu1  ;;  %v2325_v14 = vpop.f32.mrb[1].mxu0  ;;  %v334_v16 = vsel %vm333_vm11, %v279_v8, -inf }
 0x374   :  { %v330_v17 = vpop.f32.mrb[2].mxu0  ;;  %335 = vmax.xlane.f32.xlu1 %v334_v16 }
 0x375   :  { %v2326_v18 = vpop.f32.mrb[3].mxu0  ;;  %v337_v19 = vsel %vm333_vm11, %v328_v12, -inf }
 0x376   :  { %338 = vmax.xlane.f32.xlu0 %v337_v19 }
 0x401   :  { %v336_v20 = vpop.xlane.xlu1 %335 }
 0x402   :  { %v340_v21 = vsub.f32 %v279_v8, %v336_v20 }
 0x403   :  { %v339_v22 = vpop.xlane.xlu0 %338 }
 0x404   :  { %v342_v23 = vmul.f32 1.442695, %v340_v21  ;;  %v341_v24 = vsub.f32 %v328_v12, %v339_v22 }
 0x406   :  { %2552 = vpow2.f32 %v342_v23  ;;  %v344_v25 = vmul.f32 1.442695, %v341_v24 }
 0x408   :  { %2554 = vpow2.f32 %v344_v25 }
 0x410   :  { %v2553_v26 = vpop.eup %2552 }
 0x411   :  { %v346_v27 = vsel %vm333_vm11, %v2553_v26, 0.0 }
 0x412   :  { %v2555_v28 = vpop.eup %2554  ;;  %347 = vadd.xlane.f32.xlu0 %v346_v27 }
 0x413   :  { %v349_v29 = vsel %vm333_vm11, %v2555_v28, 0.0 }
 0x414   :  { %350 = vadd.xlane.f32.xlu1 %v349_v29 }
 0x425   :  { %407 = vrot.lane.b32.xlu1 %v2784_v42, %s2638_s19 }
 0x428   :  { %358 = vrot.lane.b32.xlu0 %v2782_v39, %s2638_s19 }
 0x429   :  { %516 = vrot.lane.b32.xlu1 %v2782_v39, %s2639_s1 }
 0x42c   :  { %514 = vrot.lane.b32.xlu0 %v2782_v39, %s2640_s20 }
 0x42d   :  { %566 = vrot.lane.b32.xlu1 %v2784_v42, %s2639_s1 }
 0x431   :  { %564 = vrot.lane.b32.xlu1 %v2784_v42, %s2640_s20 }
 0x49f   :  { %v348_v30 = vpop.xlane.xlu0 %347 }
 0x4a0   :  { %2556 = vrcp.f32 %v348_v30 }
 0x4a1   :  { %v351_v31 = vpop.xlane.xlu1 %350 }
 0x4a2   :  { %2558 = vrcp.f32 %v351_v31 }
 0x4a3   :  { %v359_v32 = vpop.permute.xlu0 %358 }
 0x4a4   :  { %v365_v33 = vsel %vm363_vm12, %v359_v32, 0 }
 0x4a5   :  { %2328 = vmatpush3.bf16.msra.mxu1 %v365_v33  ;;  %v408_v34 = vpop.permute.xlu1 %407 }
 0x4a6   :  { %v413_v35 = vsel %vm363_vm12, %v408_v34, 0  ;;  %2339 = vmatprep.subr.bf16.mxu1 %v2632_v15 }
 0x4a7   :  { %2334 = vmatpush3.bf16.msra.mxu0 %v413_v35  ;;  %v515_v47 = vpop.permute.xlu0 %514 }
 0x4a8   :  { %2345 = vmatprep.subr.bf16.mxu0 %v2632_v15 }
 0x4a9   :  { %v517_v44 = vpop.permute.xlu1 %516 }
 0x4aa   :  { %v2557_v36 = vpop.eup %2556  ;;  %v522_v46 = vsel %vm237_vm2, %v517_v44, 0 }
 0x4ab   :  { %v354_v37 = vmul.f32 %v2557_v36, %v2553_v26 }
 0x4ac   :  { %v2559_v38 = vpop.eup %2558 }
 0x4ad   :  { %v355_v41 = vmul.f32 %v2559_v38, %v2555_v28  ;;  %v356_v43 = vpack.c.bf16 %v354_v37, %v354_v37  ;;  %v567_v49 = vpop.permute.xlu1 %566  ;;  %v2521_v37 = vld [vmem:[%s3193_s6 + $0x8] sm:$0xff]  }
 0x4ae   :  { %v572_v57 = vsel %vm237_vm2, %v567_v49, 0  ;;  %v2136_v49 = vld [vmem:[%s3194_s7] ss:$0 sm:$0xff] }
 0x4af   :  { %2330 = vmatmul.mubr.msk.bf16.vlgmr.msra.gmra.mrb[8].mxu1 %vm333_vm11, %v356_v43  ;;  %v357_v45 = vpack.c.bf16 %v355_v41, %v355_v41 }
 0x4b0   :  { %2340 = vmatpush3.bf16.msra.mxu1 %v2520_v40  ;;  %2341 = vmatprep.mubr.msk.bf16.mxu1 %vm2633_vm1, %v2632_v15 }
 0x4b1   :  { %2336 = vmatmul.mubr.msk.bf16.vlgmr.msra.gmra.mrb[4].mxu0 %vm333_vm11, %v357_v45  ;;  %2351 = vmatprep.subr.bf16.mxu1 %v2632_v15  ;;  %v565_v62 = vpop.permute.xlu1 %564 }
 0x4b2   :  { %2346 = vmatpush3.bf16.xpose.msra.mxu0 %v522_v46  ;;  %2347 = vmatprep.mubr.msk.bf16.mxu0 %vm2633_vm1, %v2632_v15 }
 0x4b3   :  { %2357 = vmatprep.subr.bf16.mxu0 %v2632_v15 }
 0x4b9   :  { %2348 = vmatmul.mubr.msk.bf16.vlgmr.msra.gmra.mrb[8].mxu0 %vm237_vm2, %v515_v47 }
 0x4ba   :  { %2359 = vmatprep.mubr.msk.bf16.mxu0 %vm2633_vm1, %v2632_v15 }
 0x582   :  { %v401_v48 = vpop.f32.mrb[8].mxu1 }
 0x583   :  { %v2331_v50 = vpop.f32.mrb[9].mxu1 }
 0x584   :  { %v404_v51 = vpop.f32.mrb[10].mxu1  ;;  %v449_v52 = vpop.f32.mrb[4].mxu0 }
 0x585   :  { %v455_v53 = vpack.c.bf16 %v449_v52, %v401_v48  ;;  %v2332_v54 = vpop.f32.mrb[11].mxu1  ;;  %v2337_v55 = vpop.f32.mrb[5].mxu0 }
 0x586   :  { %v452_v56 = vpop.f32.mrb[6].mxu0 }
 0x587   :  { %v2338_v58 = vpop.f32.mrb[7].mxu0  ;;  %2342 = vmatmul.mubr.msk.bf16.vlgmr.msra.gmra.mrb[12].mxu1 %vm237_vm2, %v455_v53 }
 0x588   :  { %2352 = vmatpush3.bf16.xpose.msra.mxu1 %v572_v57  ;;  %2353 = vmatprep.mubr.msk.bf16.mxu1 %vm2633_vm1, %v2632_v15 }
 0x589   :  { %2363 = vmatprep.subr.bf16.mxu1 %v2632_v15 }
 0x58c   :  { %v558_v59 = vpop.f32.mrb[8].mxu0 }
 0x58d   :  { %v559_v60 = vadd.f32 %v558_v59, %v2805_v5  ;;  %v2349_v61 = vpop.f32.mrb[9].mxu0 }
 0x58e   :  { %v561_v63 = vpop.f32.mrb[10].mxu0 }
 0x58f   :  { %v2350_v2 = vpop.f32.mrb[11].mxu0  ;;  %2354 = vmatmul.mubr.msk.bf16.vlgmr.msra.gmra.mrb[16].mxu1 %vm237_vm2, %v565_v62  ;;  %v614_v3 = vsel %vm333_vm11, %v559_v60, -inf }
 0x590   :  { %615 = vmax.xlane.f32.xlu0 %v614_v3  ;;  %2365 = vmatprep.mubr.msk.bf16.mxu1 %vm2633_vm1, %v2632_v15 }
 0x61d   :  { %v616_v4 = vpop.xlane.xlu0 %615 }
 0x61e   :  { %v620_v6 = vsub.f32 %v559_v60, %v616_v4 }
 0x620   :  { %v622_v8 = vmul.f32 1.442695, %v620_v6 }
 0x622   :  { %2560 = vpow2.f32 %v622_v8 }
 0x62c   :  { %v2561_v9 = vpop.eup %2560 }
 0x62d   :  { %v626_v10 = vsel %vm333_vm11, %v2561_v9, 0.0 }
 0x62e   :  { %627 = vadd.xlane.f32.xlu0 %v626_v10  ;;  %v2522_v10 = vld [vmem:[%s3197_s10] sm:$0xff]  }
 0x65a   :  { %v499_v11 = vpop.f32.mrb[12].mxu1 }
 0x65b   :  { %v2343_v12 = vpop.f32.mrb[13].mxu1  ;;  %v512_v50 = vadd.f32 %v2136_v49, %v499_v11  ;;  %v2523_v11 = vld [vmem:[%s3197_s10 + $0x8] sm:$0xff]  }
 0x65c   :  { %v502_v13 = vpop.f32.mrb[14].mxu1 }
 0x65d   :  { %v2344_v14 = vpop.f32.mrb[15].mxu1  ;;  %v513_v52 = vadd.f32 %v2136_v49, %v502_v13 }
 0x662   :  { %v608_v16 = vpop.f32.mrb[16].mxu1 }
 0x663   :  { %v609_v17 = vadd.f32 %v608_v16, %v2807_v7  ;;  %v2355_v18 = vpop.f32.mrb[17].mxu1 }
 0x664   :  { %v611_v19 = vpop.f32.mrb[18].mxu1 }
 0x665   :  { %v2356_v20 = vpop.f32.mrb[19].mxu1  ;;  %v617_v21 = vsel %vm333_vm11, %v609_v17, -inf }
 0x666   :  { %618 = vmax.xlane.f32.xlu1 %v617_v21  ;;  %v2143_v20 = vld [vmem:[%s3195_s8] ss:$0 sm:$0xff] }
 0x677   :  { %686 = vrot.lane.b32.xlu1 %v2784_v42, %s2641_s2 }
 0x6bb   :  { %v628_v29 = vpop.xlane.xlu0 %627 }
 0x6f3   :  { %v619_v22 = vpop.xlane.xlu1 %618 }
 0x6f4   :  { %v621_v23 = vsub.f32 %v609_v17, %v619_v22 }
 0x6f6   :  { %v624_v24 = vmul.f32 1.442695, %v621_v23 }
 0x6f7   :  { %v687_v25 = vpop.permute.xlu1 %686 }
 0x6f8   :  { %2562 = vpow2.f32 %v624_v24  ;;  %v692_v26 = vsel %vm363_vm12, %v687_v25, 0  ;;  %v2144_v25 = vld [vmem:[%s3196_s9] ss:$0 sm:$0xff] }
 0x6f9   :  { %2364 = vmatpush3.bf16.msra.mxu1 %v692_v26  ;;  %2564 = vrcp.f32 %v628_v29 }
 0x6fa   :  { %2375 = vmatprep.subr.bf16.mxu1 %v2632_v15 }
 0x702   :  { %v2563_v27 = vpop.eup %2562 }
 0x703   :  { %v629_v28 = vsel %vm333_vm11, %v2563_v27, 0.0  ;;  %v2565_v42 = vpop.eup %2564 }
 0x704   :  { %630 = vadd.xlane.f32.xlu0 %v629_v28  ;;  %v634_v31 = vmul.f32 %v2565_v42, %v2561_v9  ;;  %v2524_v42 = vld [vmem:[%s3199_s12] sm:$0xff]  }
 0x706   :  { %v636_v34 = vpack.c.bf16 %v634_v31, %v634_v31  ;;  %v2526_v31 = vld [vmem:[%s3199_s12 + $0x10] sm:$0xff]  }
 0x71a   :  { %638 = vrot.lane.b32.xlu0 %v2782_v39, %s2641_s2 }
 0x791   :  { %v631_v30 = vpop.xlane.xlu0 %630 }
 0x792   :  { %2566 = vrcp.f32 %v631_v30  ;;  %v2525_v30 = vld [vmem:[%s3199_s12 + $0x8] sm:$0xff]  }
 0x795   :  { %v639_v32 = vpop.permute.xlu0 %638 }
 0x796   :  { %v644_v33 = vsel %vm363_vm12, %v639_v32, 0  ;;  %v2527_v32 = vld [vmem:[%s3199_s12 + $0x18] sm:$0xff]  }
 0x797   :  { %2358 = vmatpush3.bf16.msra.mxu0 %v644_v33  ;;  %v2528_v33 = vld [vmem:[%s3199_s12 + $0x20] sm:$0xff]  }
 0x798   :  { %2369 = vmatprep.subr.bf16.mxu0 %v2632_v15 }
 0x79a   :  { %2360 = vmatmul.mubr.msk.bf16.vlgmr.msra.gmra.mrb[12].mxu0 %vm333_vm11, %v636_v34  ;;  %v2529_v34 = vld [vmem:[%s3199_s12 + $0x28] sm:$0xff]  }
 0x79b   :  { %2371 = vmatprep.mubr.msk.bf16.mxu0 %vm2633_vm1, %v2632_v15  ;;  %2370 = vmatpush3.bf16.msra.mxu0 %v2521_v37 }
 0x79c   :  { %v2567_v35 = vpop.eup %2566  ;;  %2383 = vmatprep.subr.bf16.mxu0 %v2632_v15 }
 0x79d   :  { %v635_v39 = vmul.f32 %v2567_v35, %v2563_v27  ;;  %v2530_v35 = vld [vmem:[%s3199_s12 + $0x30] sm:$0xff]  }
 0x79f   :  { %v637_v36 = vpack.c.bf16 %v635_v39, %v635_v39  ;;  %v2531_v39 = vld [vmem:[%s3199_s12 + $0x38] sm:$0xff]  }
 0x7a1   :  { %2366 = vmatmul.mubr.msk.bf16.vlgmr.msra.gmra.mrb[20].mxu1 %vm333_vm11, %v637_v36  ;;  %v2145_v36 = vld [vmem:[%s3198_s11] ss:$0 sm:$0xff] }
 0x7a2   :  { %2379 = vmatprep.mubr.msk.bf16.mxu1 %vm2633_vm1, %v2632_v15  ;;  %2376 = vmatpush3.bf16.msra.mxu1 %v2522_v10 }
 0x7a3   :  { %2377 = vmatprep.subr.bf16.mxu1 %v2632_v15 }
 0x7a6   :  { %2378 = vmatpush3.bf16.msra.mxu1 %v2523_v11 }
 0x7a7   :  { %2403 = vmatprep.subr.bf16.mxu1 %v2632_v15 }
 0x86d   :  { %v680_v38 = vpop.f32.mrb[12].mxu0 }
 0x86e   :  { %v2361_v40 = vpop.f32.mrb[13].mxu0 }
 0x86f   :  { %v683_v41 = vpop.f32.mrb[14].mxu0 }
 0x870   :  { %v2362_v43 = vpop.f32.mrb[15].mxu0 }
 0x874   :  { %v728_v44 = vpop.f32.mrb[20].mxu1 }
 0x875   :  { %v734_v45 = vpack.c.bf16 %v728_v44, %v680_v38  ;;  %v2367_v46 = vpop.f32.mrb[21].mxu1 }
 0x876   :  { %v731_v47 = vpop.f32.mrb[22].mxu1 }
 0x877   :  { %v2368_v48 = vpop.f32.mrb[23].mxu1  ;;  %2372 = vmatmul.mubr.msk.bf16.vlgmr.msra.gmra.mrb[16].mxu0 %vm237_vm2, %v734_v45 }
 0x878   :  { %2399 = vmatprep.mubr.msk.bf16.mxu0 %vm2633_vm1, %v2632_v15  ;;  %2384 = vmatpush3.bf16.msra.mxu0 %v2524_v42 }
 0x879   :  { %2385 = vmatprep.subr.bf16.mxu0 %v2632_v15 }
 0x87c   :  { %2386 = vmatpush3.bf16.msra.mxu0 %v2525_v30 }
 0x87d   :  { %2387 = vmatprep.subr.bf16.mxu0 %v2632_v15 }
 0x880   :  { %2388 = vmatpush3.bf16.msra.mxu0 %v2526_v31 }
 0x881   :  { %2389 = vmatprep.subr.bf16.mxu0 %v2632_v15 }
 0x884   :  { %2390 = vmatpush3.bf16.msra.mxu0 %v2527_v32  ;;  %v2160_v32 = vld [vmem:[%s3212_s23 + $0x1] ss:$0 sm:$0xff] }
 0x885   :  { %2391 = vmatprep.subr.bf16.mxu0 %v2632_v15 }
 0x888   :  { %2392 = vmatpush3.bf16.msra.mxu0 %v2528_v33 }
 0x889   :  { %2393 = vmatprep.subr.bf16.mxu0 %v2632_v15 }
 0x88c   :  { %2394 = vmatpush3.bf16.msra.mxu0 %v2529_v34 }
 0x88d   :  { %2395 = vmatprep.subr.bf16.mxu0 %v2632_v15 }
 0x890   :  { %2396 = vmatpush3.bf16.msra.mxu0 %v2530_v35 }
 0x891   :  { %2397 = vmatprep.subr.bf16.mxu0 %v2632_v15 }
 0x894   :  { %2398 = vmatpush3.bf16.msra.mxu0 %v2531_v39 }
 0x895   :  { %2429 = vmatprep.subr.bf16.mxu0 %v2632_v15 }
 0x94a   :  { %v778_v51 = vpop.f32.mrb[16].mxu0 }
 0x94b   :  { %v785_v53 = vadd.f32 %v778_v51, %v512_v50  ;;  %v2373_v54 = vpop.f32.mrb[17].mxu0 }
 0x94c   :  { %v781_v55 = vpop.f32.mrb[18].mxu0 }
 0x94d   :  { %v2885_v56 = vadd.f32 %v785_v53, %v2741_v0  ;;  %v786_v57 = vadd.f32 %v781_v55, %v513_v52  ;;  %v2374_v58 = vpop.f32.mrb[19].mxu0 }
 0x94f   :  { %v2888_v59 = vadd.f32 %v786_v57, %v2746_v1  ;;  %v791_v60 = vsel %vm115_vm0, %v2885_v56, 0.0 }
 0x950   :  { %792 = vadd.xlane.f32.xlu1 %v791_v60 }
 0x951   :  { %v794_v61 = vsel %vm115_vm0, %v2888_v59, 0.0 }
 0x952   :  { %795 = vadd.xlane.f32.xlu0 %v794_v61 }
 0x9dd   :  { %v793_v62 = vpop.xlane.xlu1 %792 }
 0x9de   :  { %v797_v63 = vmul.f32 0.03125, %v793_v62 }
 0x9df   :  { %v796_v2 = vpop.xlane.xlu0 %795 }
 0x9e0   :  { %v799_v3 = vsub.f32 %v2885_v56, %v797_v63  ;;  %v798_v0 = vmul.f32 0.03125, %v796_v2 }
 0x9e2   :  { %v800_v4 = vsub.f32 %v2888_v59, %v798_v0  ;;  %v801_v6 = vmul.f32 %v799_v3, %v799_v3 }
 0x9e4   :  { %v803_v1 = vsel %vm115_vm0, %v801_v6, 0.0  ;;  %v802_v8 = vmul.f32 %v800_v4, %v800_v4 }
 0x9e5   :  { %804 = vadd.xlane.f32.xlu0 %v803_v1 }
 0x9e6   :  { %v806_v9 = vsel %vm115_vm0, %v802_v8, 0.0 }
 0x9e7   :  { %807 = vadd.xlane.f32.xlu1 %v806_v9 }
 0xa72   :  { %v805_v12 = vpop.xlane.xlu0 %804 }
 0xa73   :  { %v809_v13 = vmul.f32 0.03125, %v805_v12 }
 0xa74   :  { %v808_v14 = vpop.xlane.xlu1 %807 }
 0xa75   :  { %v811_v16 = vadd.f32 1e-05, %v809_v13  ;;  %v810_v17 = vmul.f32 0.03125, %v808_v14 }
 0xa77   :  { %2568 = vrsqrt.f32 %v811_v16  ;;  %v812_v18 = vadd.f32 1e-05, %v810_v17 }
 0xa79   :  { %2570 = vrsqrt.f32 %v812_v18 }
 0xa81   :  { %v2569_v19 = vpop.eup %2568 }
 0xa82   :  { %v815_v21 = vmul.f32 %v2569_v19, %v799_v3 }
 0xa83   :  { %v2571_v22 = vpop.eup %2570 }
 0xa84   :  { %v823_v23 = vmul.f32 %v2143_v20, %v815_v21  ;;  %v816_v24 = vmul.f32 %v2571_v22, %v800_v4  ;;  %v2157_v4 = vld [vmem:[%s3200_s13] ss:$0 sm:$0xff] }
 0xa86   :  { %v824_v26 = vmul.f32 %v2143_v20, %v816_v24  ;;  %v831_v27 = vadd.f32 %v2144_v25, %v823_v23  ;;  %v2532_v24 = vld [vmem:[%s3191_s4 + $0x10] sm:$0xff]  }
 0xa88   :  { %v832_v28 = vadd.f32 %v2144_v25, %v824_v26  ;;  %v2533_v25 = vld [vmem:[%s3191_s4 + $0x18] sm:$0xff]  }
 0xa8a   :  { %v833_v29 = vpack.c.bf16 %v832_v28, %v831_v27 }
 0xa8c   :  { %2380 = vmatmul.mubr.msk.bf16.vlgmr.msra.gmra.mrb[24].mxu1 %vm115_vm0, %v833_v29 }
 0xa8d   :  { %2407 = vmatprep.mubr.msk.bf16.mxu1 %vm2633_vm1, %v2632_v15  ;;  %2404 = vmatpush3.bf16.msra.mxu1 %v2532_v24 }
 0xa8e   :  { %2405 = vmatprep.subr.bf16.mxu1 %v2632_v15 }
 0xa91   :  { %2406 = vmatpush3.bf16.msra.mxu1 %v2533_v25 }
 0xa92   :  { %2411 = vmatprep.subr.bf16.mxu1 %v2632_v15 }
 0xb5f   :  { %v894_v37 = vpop.f32.mrb[24].mxu1 }
 0xb60   :  { %v895_v38 = vadd.f32 %v2145_v36, %v894_v37  ;;  %v2381_v40 = vpop.f32.mrb[25].mxu1 }
 0xb61   :  { %v897_v41 = vpop.f32.mrb[26].mxu1 }
 0xb62   :  { %v903_v43 = vmul.f32 0.044715, %v895_v38  ;;  %v898_v44 = vadd.f32 %v2145_v36, %v897_v41  ;;  %v2382_v45 = vpop.f32.mrb[27].mxu1  ;;  %v901_v60 = vmul.f32 0.5, %v895_v38  ;;  %v2161_v36 = vld [vmem:[%s3190_s3 + $0x1] ss:$0 sm:$0xff] }
 0xb64   :  { %v905_v46 = vmul.f32 %v903_v43, %v895_v38  ;;  %v904_v47 = vmul.f32 0.044715, %v898_v44  ;;  %v902_v61 = vmul.f32 0.5, %v898_v44  ;;  %v2167_v43 = vld [vmem:[%s3192_s5 + $0x1] ss:$0 sm:$0xff] }
 0xb66   :  { %v907_v48 = vmul.f32 %v905_v46, %v895_v38  ;;  %v906_v49 = vmul.f32 %v904_v47, %v898_v44 }
 0xb68   :  { %v909_v50 = vadd.f32 %v907_v48, %v895_v38  ;;  %v908_v51 = vmul.f32 %v906_v49, %v898_v44 }
 0xb6a   :  { %v911_v52 = vmul.f32 0.7978846, %v909_v50  ;;  %v910_v53 = vadd.f32 %v908_v51, %v898_v44 }
 0xb6c   :  { %2572 = vtanh.f32 %v911_v52  ;;  %v912_v54 = vmul.f32 0.7978846, %v910_v53 }
 0xb6e   :  { %2574 = vtanh.f32 %v912_v54 }
 0xb76   :  { %v2573_v55 = vpop.eup %2572 }
 0xb77   :  { %v915_v57 = vadd.f32 1.0, %v2573_v55 }
 0xb78   :  { %v2575_v58 = vpop.eup %2574 }
 0xb79   :  { %v916_v62 = vadd.f32 1.0, %v2575_v58  ;;  %v917_v63 = vmul.f32 %v915_v57, %v901_v60 }
 0xb7b   :  { %v918_v2 = vmul.f32 %v916_v62, %v902_v61 }
 0xb7d   :  { %v919_v3 = vpack.c.bf16 %v918_v2, %v917_v63 }
 0xb7f   :  { %2400 = vmatmul.mubr.bf16.vlgmr.msra.gmra.mrb[20].mxu0 %v919_v3 }
 0xb80   :  { %2431 = vmatprep.mubr.msk.bf16.mxu0 %vm2633_vm1, %v2632_v15 }
 0xc52   :  { %v1018_v0 = vpop.f32.mrb[20].mxu0 }
 0xc53   :  { %v1025_v6 = vadd.f32 %v1018_v0, %v2885_v56  ;;  %v2401_v1 = vpop.f32.mrb[21].mxu0 }
 0xc54   :  { %v1021_v8 = vpop.f32.mrb[22].mxu0 }
 0xc55   :  { %v2956_v9 = vadd.f32 %v2157_v4, %v1025_v6  ;;  %v1026_v10 = vadd.f32 %v1021_v8, %v2888_v59  ;;  %v2402_v11 = vpop.f32.mrb[23].mxu0 }
 0xc57   :  { %v2959_v12 = vadd.f32 %v2157_v4, %v1026_v10  ;;  %v1040_v13 = vsel %vm115_vm0, %v2956_v9, 0.0 }
 0xc58   :  { %1041 = vadd.xlane.f32.xlu0 %v1040_v13 }
 0xc59   :  { %v1043_v14 = vsel %vm115_vm0, %v2959_v12, 0.0 }
 0xc5a   :  { %1044 = vadd.xlane.f32.xlu1 %v1043_v14 }
 0xce5   :  { %v1042_v16 = vpop.xlane.xlu0 %1041 }
 0xce6   :  { %v1046_v17 = vmul.f32 0.03125, %v1042_v16 }
 0xce7   :  { %v1045_v56 = vpop.xlane.xlu1 %1044 }
 0xce8   :  { %v1048_v18 = vsub.f32 %v2956_v9, %v1046_v17  ;;  %v1047_v19 = vmul.f32 0.03125, %v1045_v56 }
 0xcea   :  { %v1049_v20 = vsub.f32 %v2959_v12, %v1047_v19  ;;  %v1050_v59 = vmul.f32 %v1048_v18, %v1048_v18 }
 0xcec   :  { %v1052_v21 = vsel %vm115_vm0, %v1050_v59, 0.0  ;;  %v1051_v22 = vmul.f32 %v1049_v20, %v1049_v20 }
 0xced   :  { %1053 = vadd.xlane.f32.xlu0 %v1052_v21 }
 0xcee   :  { %v1055_v23 = vsel %vm115_vm0, %v1051_v22, 0.0 }
 0xcef   :  { %1056 = vadd.xlane.f32.xlu1 %v1055_v23 }
 0xd7a   :  { %v1054_v26 = vpop.xlane.xlu0 %1053 }
 0xd7b   :  { %v1058_v27 = vmul.f32 0.03125, %v1054_v26 }
 0xd7c   :  { %v1057_v28 = vpop.xlane.xlu1 %1056 }
 0xd7d   :  { %v1060_v29 = vadd.f32 1e-05, %v1058_v27  ;;  %v1059_v42 = vmul.f32 0.03125, %v1057_v28 }
 0xd7f   :  { %2576 = vrsqrt.f32 %v1060_v29  ;;  %v1061_v30 = vadd.f32 1e-05, %v1059_v42 }
 0xd81   :  { %2578 = vrsqrt.f32 %v1061_v30 }
 0xd89   :  { %v2577_v31 = vpop.eup %2576 }
 0xd8a   :  { %v1064_v33 = vmul.f32 %v2577_v31, %v1048_v18 }
 0xd8b   :  { %v2579_v34 = vpop.eup %2578 }
 0xd8c   :  { %v1072_v35 = vmul.f32 %v2160_v32, %v1064_v33  ;;  %v1065_v39 = vmul.f32 %v2579_v34, %v1049_v20  ;;  %v2534_v33 = vld [vmem:[%s3193_s6 + $0x10] sm:$0xff]  }
 0xd8e   :  { %v1073_v37 = vmul.f32 %v2160_v32, %v1065_v39  ;;  %v1080_v38 = vadd.f32 %v2161_v36, %v1072_v35 }
 0xd90   :  { %v1081_v40 = vadd.f32 %v2161_v36, %v1073_v37 }
 0xd92   :  { %v1082_v41 = vpack.c.bf16 %v1081_v40, %v1080_v38 }
 0xd94   :  { %2408 = vmatmul.mubr.msk.bf16.vlgmr.msra.gmra.mrb[28].mxu1 %vm115_vm0, %v1082_v41 }
 0xd95   :  { %2413 = vmatprep.mubr.msk.bf16.mxu1 %vm2633_vm1, %v2632_v15 }
 0xe67   :  { %v1145_v44 = vpop.f32.mrb[28].mxu1 }
 0xe68   :  { %v1146_v45 = vadd.f32 %v2167_v43, %v1145_v44  ;;  %v2409_v46 = vpop.f32.mrb[29].mxu1 }
 0xe69   :  { %v1148_v47 = vpop.f32.mrb[30].mxu1 }
 0xe6a   :  { %v2989_v48 = vpack.c.bf16 %v1146_v45, %v1146_v45  ;;  %v1149_v49 = vadd.f32 %v2167_v43, %v1148_v47  ;;  %v2410_v50 = vpop.f32.mrb[31].mxu1 }
 0xe6c   :  { %v2991_v51 = vpack.c.bf16 %v1149_v49, %v1149_v49  ;;  %1162 = vrot.lane.b32.xlu0 %v2989_v48, %s2634_s28 }
 0xe6e   :  { %1211 = vrot.lane.b32.xlu1 %v2991_v51, %s2634_s28 }
 0xede   :  { %v1163_v52 = vpop.permute.xlu0 %1162 }
 0xedf   :  { %v1168_v53 = vsel %vm237_vm2, %v1163_v52, 0 }
 0xee0   :  { %2412 = vmatpush3.bf16.xpose.msra.mxu1 %v1168_v53  ;;  %v1212_v54 = vpop.permute.xlu1 %1211 }
 0xee1   :  { %2417 = vmatprep.subr.bf16.mxu1 %v2632_v15  ;;  %v1217_v55 = vsel %vm237_vm2, %v1212_v54, 0 }
 0xee7   :  { %2414 = vmatmul.mubr.msk.bf16.vlgmr.msra.gmra.mrb[32].mxu1 %vm237_vm2, %v2989_v48 }
 0xee8   :  { %2418 = vmatpush3.bf16.xpose.msra.mxu1 %v1217_v55  ;;  %2419 = vmatprep.mubr.msk.bf16.mxu1 %vm2633_vm1, %v2632_v15 }
 0xee9   :  { %2423 = vmatprep.subr.bf16.mxu1 %v2632_v15 }
 0xeef   :  { %2420 = vmatmul.mubr.msk.bf16.vlgmr.msra.gmra.mrb[36].mxu1 %vm237_vm2, %v2991_v51 }
 0xef0   :  { %2425 = vmatprep.mubr.msk.bf16.mxu1 %vm2633_vm1, %v2632_v15 }
 0xfba   :  { %v1204_v57 = vpop.f32.mrb[32].mxu1 }
 0xfbb   :  { %v1205_v58 = vadd.f32 %v1204_v57, %v2805_v5  ;;  %v2415_v60 = vpop.f32.mrb[33].mxu1 }
 0xfbc   :  { %v1207_v61 = vpop.f32.mrb[34].mxu1 }
 0xfbd   :  { %v2416_v62 = vpop.f32.mrb[35].mxu1  ;;  %v1259_v63 = vsel %vm333_vm11, %v1205_v58, -inf }
 0xfbe   :  { %1260 = vmax.xlane.f32.xlu1 %v1259_v63 }
 0xfc2   :  { %v1253_v2 = vpop.f32.mrb[36].mxu1 }
 0xfc3   :  { %v1254_v3 = vadd.f32 %v1253_v2, %v2807_v7  ;;  %v2421_v0 = vpop.f32.mrb[37].mxu1 }
 0xfc4   :  { %v1256_v4 = vpop.f32.mrb[38].mxu1 }
 0xfc5   :  { %v2422_v6 = vpop.f32.mrb[39].mxu1  ;;  %v1262_v1 = vsel %vm333_vm11, %v1254_v3, -inf }
 0xfc6   :  { %1263 = vmax.xlane.f32.xlu0 %v1262_v1 }
0x104b   :  { %v1261_v8 = vpop.xlane.xlu1 %1260 }
0x104c   :  { %v1265_v10 = vsub.f32 %v1205_v58, %v1261_v8 }
0x104e   :  { %v1267_v11 = vmul.f32 1.442695, %v1265_v10 }
0x1050   :  { %2580 = vpow2.f32 %v1267_v11 }
0x1053   :  { %v1264_v13 = vpop.xlane.xlu0 %1263 }
0x1054   :  { %v1266_v14 = vsub.f32 %v1254_v3, %v1264_v13 }
0x1056   :  { %v1269_v16 = vmul.f32 1.442695, %v1266_v14 }
0x1058   :  { %2582 = vpow2.f32 %v1269_v16 }
0x105a   :  { %v2581_v17 = vpop.eup %2580 }
0x105b   :  { %v1271_v56 = vsel %vm333_vm11, %v2581_v17, 0.0 }
0x105c   :  { %1272 = vadd.xlane.f32.xlu0 %v1271_v56 }
0x1062   :  { %v2583_v18 = vpop.eup %2582 }
0x1063   :  { %v1274_v19 = vsel %vm333_vm11, %v2583_v18, 0.0 }
0x1064   :  { %1275 = vadd.xlane.f32.xlu1 %v1274_v19 }
0x1072   :  { %1283 = vrot.lane.b32.xlu0 %v2989_v48, %s2638_s19 }
0x1075   :  { %1331 = vrot.lane.b32.xlu1 %v2991_v51, %s2638_s19 }
0x1076   :  { %1438 = vrot.lane.b32.xlu0 %v2989_v48, %s2640_s20 }
0x1079   :  { %1440 = vrot.lane.b32.xlu1 %v2989_v48, %s2639_s1 }
0x107d   :  { %1490 = vrot.lane.b32.xlu1 %v2991_v51, %s2639_s1 }
0x1081   :  { %1488 = vrot.lane.b32.xlu1 %v2991_v51, %s2640_s20 }
0x10e9   :  { %v1273_v20 = vpop.xlane.xlu0 %1272 }
0x10ea   :  { %2584 = vrcp.f32 %v1273_v20 }
0x10ed   :  { %v1284_v59 = vpop.permute.xlu0 %1283 }
0x10ee   :  { %v1289_v21 = vsel %vm363_vm12, %v1284_v59, 0 }
0x10ef   :  { %2424 = vmatpush3.bf16.msra.mxu1 %v1289_v21 }
0x10f0   :  { %2435 = vmatprep.subr.bf16.mxu1 %v2632_v15 }
0x10f1   :  { %v1276_v22 = vpop.xlane.xlu1 %1275  ;;  %v1439_v32 = vpop.permute.xlu0 %1438 }
0x10f2   :  { %2586 = vrcp.f32 %v1276_v22 }
0x10f4   :  { %v2585_v23 = vpop.eup %2584 }
0x10f5   :  { %v1279_v24 = vmul.f32 %v2585_v23, %v2581_v17  ;;  %v1332_v25 = vpop.permute.xlu1 %1331 }
0x10f6   :  { %v1337_v26 = vsel %vm363_vm12, %v1332_v25, 0 }
0x10f7   :  { %2430 = vmatpush3.bf16.msra.mxu0 %v1337_v26  ;;  %v1281_v27 = vpack.c.bf16 %v1279_v24, %v1279_v24  ;;  %v2535_v24 = vld [vmem:[%s3193_s6 + $0x18] sm:$0xff]  }
0x10f8   :  { %2441 = vmatprep.subr.bf16.mxu0 %v2632_v15 }
0x10f9   :  { %2426 = vmatmul.mubr.msk.bf16.vlgmr.msra.gmra.mrb[40].mxu1 %vm333_vm11, %v1281_v27  ;;  %v1441_v42 = vpop.permute.xlu1 %1440 }
0x10fa   :  { %2437 = vmatprep.mubr.msk.bf16.mxu1 %vm2633_vm1, %v2632_v15  ;;  %v1446_v31 = vsel %vm237_vm2, %v1441_v42, 0  ;;  %2436 = vmatpush3.bf16.msra.mxu1 %v2534_v33  ;;  %v2182_v33 = vld [vmem:[%s3194_s7 + $0x1] ss:$0 sm:$0xff] }
0x10fb   :  { %2447 = vmatprep.subr.bf16.mxu1 %v2632_v15 }
0x10fc   :  { %v2587_v28 = vpop.eup %2586 }
0x10fd   :  { %v1280_v29 = vmul.f32 %v2587_v28, %v2583_v18  ;;  %v1491_v37 = vpop.permute.xlu1 %1490 }
0x10fe   :  { %v1496_v44 = vsel %vm237_vm2, %v1491_v37, 0 }
0x10ff   :  { %v1282_v30 = vpack.c.bf16 %v1280_v29, %v1280_v29 }
0x1101   :  { %2432 = vmatmul.mubr.msk.bf16.vlgmr.msra.gmra.mrb[24].mxu0 %vm333_vm11, %v1282_v30  ;;  %v1489_v50 = vpop.permute.xlu1 %1488 }
0x1102   :  { %2442 = vmatpush3.bf16.xpose.msra.mxu0 %v1446_v31  ;;  %2443 = vmatprep.mubr.msk.bf16.mxu0 %vm2633_vm1, %v2632_v15 }
0x1103   :  { %2453 = vmatprep.subr.bf16.mxu0 %v2632_v15 }
0x1109   :  { %2444 = vmatmul.mubr.msk.bf16.vlgmr.msra.gmra.mrb[28].mxu0 %vm237_vm2, %v1439_v32 }
0x110a   :  { %2455 = vmatprep.mubr.msk.bf16.mxu0 %vm2633_vm1, %v2632_v15 }
0x11cc   :  { %v1325_v34 = vpop.f32.mrb[40].mxu1 }
0x11cd   :  { %v2427_v35 = vpop.f32.mrb[41].mxu1 }
0x11ce   :  { %v1328_v39 = vpop.f32.mrb[42].mxu1 }
0x11cf   :  { %v2428_v36 = vpop.f32.mrb[43].mxu1 }
0x11d4   :  { %v1373_v38 = vpop.f32.mrb[24].mxu0 }
0x11d5   :  { %v1379_v40 = vpack.c.bf16 %v1373_v38, %v1325_v34  ;;  %v2433_v41 = vpop.f32.mrb[25].mxu0 }
0x11d6   :  { %v1376_v43 = vpop.f32.mrb[26].mxu0 }
0x11d7   :  { %v2434_v45 = vpop.f32.mrb[27].mxu0  ;;  %2438 = vmatmul.mubr.msk.bf16.vlgmr.msra.gmra.mrb[44].mxu1 %vm237_vm2, %v1379_v40 }
0x11d8   :  { %2448 = vmatpush3.bf16.xpose.msra.mxu1 %v1496_v44  ;;  %2449 = vmatprep.mubr.msk.bf16.mxu1 %vm2633_vm1, %v2632_v15 }
0x11d9   :  { %2459 = vmatprep.subr.bf16.mxu1 %v2632_v15 }
0x11dc   :  { %v1482_v46 = vpop.f32.mrb[28].mxu0 }
0x11dd   :  { %v1483_v47 = vadd.f32 %v1482_v46, %v2805_v5  ;;  %v2445_v49 = vpop.f32.mrb[29].mxu0 }
0x11de   :  { %v1485_v52 = vpop.f32.mrb[30].mxu0 }
0x11df   :  { %v2446_v53 = vpop.f32.mrb[31].mxu0  ;;  %2450 = vmatmul.mubr.msk.bf16.vlgmr.msra.gmra.mrb[48].mxu1 %vm237_vm2, %v1489_v50  ;;  %v1538_v54 = vsel %vm333_vm11, %v1483_v47, -inf }
0x11e0   :  { %1539 = vmax.xlane.f32.xlu0 %v1538_v54  ;;  %2461 = vmatprep.mubr.msk.bf16.mxu1 %vm2633_vm1, %v2632_v15 }
0x126d   :  { %v1540_v55 = vpop.xlane.xlu0 %1539 }
0x126e   :  { %v1544_v57 = vsub.f32 %v1483_v47, %v1540_v55 }
0x1270   :  { %v1546_v58 = vmul.f32 1.442695, %v1544_v57 }
0x1272   :  { %2588 = vpow2.f32 %v1546_v58  ;;  %v2536_v58 = vld [vmem:[%s3197_s10 + $0x10] sm:$0xff]  }
0x127c   :  { %v2589_v60 = vpop.eup %2588 }
0x127d   :  { %v1550_v61 = vsel %vm333_vm11, %v2589_v60, 0.0 }
0x127e   :  { %1551 = vadd.xlane.f32.xlu0 %v1550_v61 }
0x12aa   :  { %v1423_v5 = vpop.f32.mrb[44].mxu1 }
0x12ab   :  { %v2439_v62 = vpop.f32.mrb[45].mxu1  ;;  %v1436_v34 = vadd.f32 %v2182_v33, %v1423_v5 }
0x12ac   :  { %v1426_v63 = vpop.f32.mrb[46].mxu1 }
0x12ad   :  { %v2440_v2 = vpop.f32.mrb[47].mxu1  ;;  %v1437_v39 = vadd.f32 %v2182_v33, %v1426_v63 }
0x12b2   :  { %v1532_v3 = vpop.f32.mrb[48].mxu1 }
0x12b3   :  { %v1533_v0 = vadd.f32 %v1532_v3, %v2807_v7  ;;  %v2451_v4 = vpop.f32.mrb[49].mxu1 }
0x12b4   :  { %v1535_v6 = vpop.f32.mrb[50].mxu1  ;;  %v2191_v4 = vld [vmem:[%s3195_s8 + $0x1] ss:$0 sm:$0xff] }
0x12b5   :  { %v2452_v1 = vpop.f32.mrb[51].mxu1  ;;  %v1541_v8 = vsel %vm333_vm11, %v1533_v0, -inf }
0x12b6   :  { %1542 = vmax.xlane.f32.xlu1 %v1541_v8 }
0x12c7   :  { %1610 = vrot.lane.b32.xlu1 %v2991_v51, %s2641_s2 }
0x130b   :  { %v1552_v56 = vpop.xlane.xlu0 %1551 }
0x1343   :  { %v1543_v10 = vpop.xlane.xlu1 %1542 }
0x1344   :  { %v1545_v11 = vsub.f32 %v1533_v0, %v1543_v10 }
0x1346   :  { %v1548_v13 = vmul.f32 1.442695, %v1545_v11  ;;  %v2192_v11 = vld [vmem:[%s3196_s9 + $0x1] ss:$0 sm:$0xff] }
0x1347   :  { %v1611_v14 = vpop.permute.xlu1 %1610 }
0x1348   :  { %2590 = vpow2.f32 %v1548_v13  ;;  %v1616_v16 = vsel %vm363_vm12, %v1611_v14, 0 }
0x1349   :  { %2460 = vmatpush3.bf16.msra.mxu1 %v1616_v16  ;;  %2592 = vrcp.f32 %v1552_v56  ;;  %v2539_v56 = vld [vmem:[%s3199_s12 + $0x48] sm:$0xff]  }
0x134a   :  { %2471 = vmatprep.subr.bf16.mxu1 %v2632_v15 }
0x1352   :  { %v2591_v7 = vpop.eup %2590 }
0x1353   :  { %v1553_v17 = vsel %vm333_vm11, %v2591_v7, 0.0  ;;  %v2593_v51 = vpop.eup %2592 }
0x1354   :  { %1554 = vadd.xlane.f32.xlu0 %v1553_v17  ;;  %v1558_v19 = vmul.f32 %v2593_v51, %v2589_v60  ;;  %v2537_v60 = vld [vmem:[%s3197_s10 + $0x18] sm:$0xff]   ;;  %v2538_v17 = vld [vmem:[%s3199_s12 + $0x40] sm:$0xff]   ;;  %v2540_v51 = vld [vmem:[%s3199_s12 + $0x50] sm:$0xff]  }
0x1356   :  { %v1560_v21 = vpack.c.bf16 %v1558_v19, %v1558_v19  ;;  %v2542_v19 = vld [vmem:[%s3199_s12 + $0x60] sm:$0xff]  }
0x136a   :  { %1562 = vrot.lane.b32.xlu0 %v2989_v48, %s2641_s2 }
0x13e1   :  { %v1555_v18 = vpop.xlane.xlu0 %1554 }
0x13e2   :  { %2594 = vrcp.f32 %v1555_v18  ;;  %v2541_v18 = vld [vmem:[%s3199_s12 + $0x58] sm:$0xff]  }
0x13e5   :  { %v1563_v20 = vpop.permute.xlu0 %1562 }
0x13e6   :  { %v1568_v59 = vsel %vm363_vm12, %v1563_v20, 0  ;;  %v2543_v20 = vld [vmem:[%s3199_s12 + $0x68] sm:$0xff]  }
0x13e7   :  { %2454 = vmatpush3.bf16.msra.mxu0 %v1568_v59  ;;  %v2544_v59 = vld [vmem:[%s3199_s12 + $0x70] sm:$0xff]  }
0x13e8   :  { %2465 = vmatprep.subr.bf16.mxu0 %v2632_v15 }
0x13ea   :  { %2456 = vmatmul.mubr.msk.bf16.vlgmr.msra.gmra.mrb[32].mxu0 %vm333_vm11, %v1560_v21  ;;  %v2545_v21 = vld [vmem:[%s3199_s12 + $0x78] sm:$0xff]  }
0x13eb   :  { %2467 = vmatprep.mubr.msk.bf16.mxu0 %vm2633_vm1, %v2632_v15  ;;  %2466 = vmatpush3.bf16.msra.mxu0 %v2535_v24 }
0x13ec   :  { %v2595_v22 = vpop.eup %2594  ;;  %2479 = vmatprep.subr.bf16.mxu0 %v2632_v15 }
0x13ed   :  { %v1559_v48 = vmul.f32 %v2595_v22, %v2591_v7  ;;  %v2198_v22 = vld [vmem:[%s3198_s11 + $0x1] ss:$0 sm:$0xff] }
0x13ef   :  { %v1561_v23 = vpack.c.bf16 %v1559_v48, %v1559_v48 }
0x13f1   :  { %2462 = vmatmul.mubr.msk.bf16.vlgmr.msra.gmra.mrb[52].mxu1 %vm333_vm11, %v1561_v23 }
0x13f2   :  { %2475 = vmatprep.mubr.msk.bf16.mxu1 %vm2633_vm1, %v2632_v15  ;;  %2472 = vmatpush3.bf16.msra.mxu1 %v2536_v58 }
0x13f3   :  { %2473 = vmatprep.subr.bf16.mxu1 %v2632_v15 }
0x13f6   :  { %2474 = vmatpush3.bf16.msra.mxu1 %v2537_v60 }
0x13f7   :  { %2499 = vmatprep.subr.bf16.mxu1 %v2632_v15 }
0x14bd   :  { %v1604_v25 = vpop.f32.mrb[32].mxu0 }
0x14be   :  { %v2457_v26 = vpop.f32.mrb[33].mxu0 }
0x14bf   :  { %v1607_v27 = vpop.f32.mrb[34].mxu0 }
0x14c0   :  { %v2458_v28 = vpop.f32.mrb[35].mxu0 }
0x14c4   :  { %v1652_v29 = vpop.f32.mrb[52].mxu1 }
0x14c5   :  { %v1658_v42 = vpack.c.bf16 %v1652_v29, %v1604_v25  ;;  %v2463_v30 = vpop.f32.mrb[53].mxu1 }
0x14c6   :  { %v1655_v31 = vpop.f32.mrb[54].mxu1 }
0x14c7   :  { %v2464_v32 = vpop.f32.mrb[55].mxu1  ;;  %2468 = vmatmul.mubr.msk.bf16.vlgmr.msra.gmra.mrb[36].mxu0 %vm237_vm2, %v1658_v42 }
0x14c8   :  { %2495 = vmatprep.mubr.msk.bf16.mxu0 %vm2633_vm1, %v2632_v15  ;;  %2480 = vmatpush3.bf16.msra.mxu0 %v2538_v17 }
0x14c9   :  { %2481 = vmatprep.subr.bf16.mxu0 %v2632_v15 }
0x14cc   :  { %2482 = vmatpush3.bf16.msra.mxu0 %v2539_v56 }
0x14cd   :  { %2483 = vmatprep.subr.bf16.mxu0 %v2632_v15 }
0x14d0   :  { %2484 = vmatpush3.bf16.msra.mxu0 %v2540_v51 }
0x14d1   :  { %2485 = vmatprep.subr.bf16.mxu0 %v2632_v15 }
0x14d4   :  { %2486 = vmatpush3.bf16.msra.mxu0 %v2541_v18 }
0x14d5   :  { %2487 = vmatprep.subr.bf16.mxu0 %v2632_v15 }
0x14d8   :  { %2488 = vmatpush3.bf16.msra.mxu0 %v2542_v19 }
0x14d9   :  { %2489 = vmatprep.subr.bf16.mxu0 %v2632_v15 }
0x14dc   :  { %2490 = vmatpush3.bf16.msra.mxu0 %v2543_v20  ;;  %v2228_v20 = vld [vmem:[%s3201_s14] ss:$0 sm:$0xff] }
0x14dd   :  { %2491 = vmatprep.subr.bf16.mxu0 %v2632_v15 }
0x14e0   :  { %2492 = vmatpush3.bf16.msra.mxu0 %v2544_v59  ;;  %v2229_v59 = vld [vmem:[%s3202_s15] ss:$0 sm:$0xff]  ;;  %s2642_s15 = smov [#allocation2]  }
0x14e1   :  { %2493 = vmatprep.subr.bf16.mxu0 %v2632_v15  ;;  %s2116_s8 = sshll.u32 %s2642_s15, 4  ;;  %s2117_s8 = int_to_ptr.vmem [resolvable:$true] %s2116_s8 }
0x14e2   :  { %s2608_s25 = scalar_lea.vmem %s2117_s8, 32  ;;  %p2613_p1 = scmp.lt.s32.totalorder %s2117_s8, %s2117_s8 }
0x14e3   :  { %p2609_p0 = scmp.ne.s32.totalorder %s2117_s8, %s2608_s25  ;;  %p2614_p2 = scmp.lt.s32.totalorder %s2608_s25, %s2608_s25 }
0x14e4   :  { %2494 = vmatpush3.bf16.msra.mxu0 %v2545_v21 }
0x14e5   :  { %p2615_p3 = por %p2614_p2, %p2613_p1 }
0x14e7   :  { %p2616_p4 = pnand %p2615_p3, %p2609_p0 }
0x159a   :  { %v1702_v35 = vpop.f32.mrb[36].mxu0 }
0x159b   :  { %v1709_v36 = vadd.f32 %v1702_v35, %v1436_v34  ;;  %v2469_v37 = vpop.f32.mrb[37].mxu0 }
0x159c   :  { %v1705_v38 = vpop.f32.mrb[38].mxu0 }
0x159d   :  { %v3085_v40 = vadd.f32 %v1709_v36, %v2956_v9  ;;  %v1710_v41 = vadd.f32 %v1705_v38, %v1437_v39  ;;  %v2470_v43 = vpop.f32.mrb[39].mxu0 }
0x159f   :  { %v3088_v44 = vadd.f32 %v1710_v41, %v2959_v12  ;;  %v1717_v45 = vsel %vm115_vm0, %v3085_v40, 0.0 }
0x15a0   :  { %1718 = vadd.xlane.f32.xlu1 %v1717_v45 }
0x15a1   :  { %v1720_v46 = vsel %vm115_vm0, %v3088_v44, 0.0 }
0x15a2   :  { %1721 = vadd.xlane.f32.xlu0 %v1720_v46 }
0x162d   :  { %v1719_v47 = vpop.xlane.xlu1 %1718 }
0x162e   :  { %v1723_v49 = vmul.f32 0.03125, %v1719_v47 }
0x162f   :  { %v1722_v50 = vpop.xlane.xlu0 %1721 }
0x1630   :  { %v1725_v52 = vsub.f32 %v3085_v40, %v1723_v49  ;;  %v1724_v9 = vmul.f32 0.03125, %v1722_v50 }
0x1632   :  { %v1726_v53 = vsub.f32 %v3088_v44, %v1724_v9  ;;  %v1727_v54 = vmul.f32 %v1725_v52, %v1725_v52 }
0x1634   :  { %v1729_v12 = vsel %vm115_vm0, %v1727_v54, 0.0  ;;  %v1728_v55 = vmul.f32 %v1726_v53, %v1726_v53 }
0x1635   :  { %1730 = vadd.xlane.f32.xlu0 %v1729_v12 }
0x1636   :  { %v1732_v57 = vsel %vm115_vm0, %v1728_v55, 0.0 }
0x1637   :  { %1733 = vadd.xlane.f32.xlu1 %v1732_v57 }
0x16c2   :  { %v1731_v61 = vpop.xlane.xlu0 %1730 }
0x16c3   :  { %v1735_v5 = vmul.f32 0.03125, %v1731_v61 }
0x16c4   :  { %v1734_v62 = vpop.xlane.xlu1 %1733 }
0x16c5   :  { %v1737_v63 = vadd.f32 1e-05, %v1735_v5  ;;  %v1736_v2 = vmul.f32 0.03125, %v1734_v62 }
0x16c7   :  { %2596 = vrsqrt.f32 %v1737_v63  ;;  %v1738_v3 = vadd.f32 1e-05, %v1736_v2 }
0x16c9   :  { %2598 = vrsqrt.f32 %v1738_v3 }
0x16d1   :  { %v2597_v0 = vpop.eup %2596 }
0x16d2   :  { %v1741_v6 = vmul.f32 %v2597_v0, %v1725_v52  ;;  %v2227_v52 = vld [vmem:[%s3200_s13 + $0x1] ss:$0 sm:$0xff] }
0x16d3   :  { %v2599_v1 = vpop.eup %2598 }
0x16d4   :  { %v1749_v8 = vmul.f32 %v2191_v4, %v1741_v6  ;;  %v1742_v10 = vmul.f32 %v2599_v1, %v1726_v53 }
0x16d6   :  { %v1750_v13 = vmul.f32 %v2191_v4, %v1742_v10  ;;  %v1757_v14 = vadd.f32 %v2192_v11, %v1749_v8 }
0x16d8   :  { %v1758_v16 = vadd.f32 %v2192_v11, %v1750_v13  ;;  %v2546_v11 = vld [vmem:[%s3203_s16] sm:$0xff]   ;;  %v2547_v13 = vld [vmem:[%s3203_s16 + $0x8] sm:$0xff]  }
0x16da   :  { %v1759_v7 = vpack.c.bf16 %v1758_v16, %v1757_v14 }
0x16dc   :  { %2476 = vmatmul.mubr.msk.bf16.vlgmr.msra.gmra.mrb[56].mxu1 %vm115_vm0, %v1759_v7 }
0x16dd   :  { %2503 = vmatprep.mubr.msk.bf16.mxu1 %vm2633_vm1, %v2632_v15  ;;  %2500 = vmatpush3.bf16.msra.mxu1 %v2546_v11 }
0x16de   :  { %2501 = vmatprep.subr.bf16.mxu1 %v2632_v15 }
0x16e1   :  { %2502 = vmatpush3.bf16.msra.mxu1 %v2547_v13 }
0x17af   :  { %v1822_v48 = vpop.f32.mrb[56].mxu1 }
0x17b0   :  { %v1823_v23 = vadd.f32 %v2198_v22, %v1822_v48  ;;  %v2477_v24 = vpop.f32.mrb[57].mxu1 }
0x17b1   :  { %v1825_v25 = vpop.f32.mrb[58].mxu1 }
0x17b2   :  { %v1831_v26 = vmul.f32 0.044715, %v1823_v23  ;;  %v1826_v27 = vadd.f32 %v2198_v22, %v1825_v25  ;;  %v2478_v28 = vpop.f32.mrb[59].mxu1  ;;  %v1829_v41 = vmul.f32 0.5, %v1823_v23 }
0x17b4   :  { %v1833_v29 = vmul.f32 %v1831_v26, %v1823_v23  ;;  %v1832_v42 = vmul.f32 0.044715, %v1826_v27  ;;  %v1830_v43 = vmul.f32 0.5, %v1826_v27 }
0x17b6   :  { %v1835_v30 = vmul.f32 %v1833_v29, %v1823_v23  ;;  %v1834_v31 = vmul.f32 %v1832_v42, %v1826_v27 }
0x17b8   :  { %v1837_v32 = vadd.f32 %v1835_v30, %v1823_v23  ;;  %v1836_v33 = vmul.f32 %v1834_v31, %v1826_v27 }
0x17ba   :  { %v1839_v34 = vmul.f32 0.7978846, %v1837_v32  ;;  %v1838_v35 = vadd.f32 %v1836_v33, %v1826_v27  ;;  %v2230_v33 = vld [vmem:[%s3204_s17] ss:$0 sm:$0xff] }
0x17bc   :  { %2600 = vtanh.f32 %v1839_v34  ;;  %v1840_v39 = vmul.f32 0.7978846, %v1838_v35 }
0x17be   :  { %2602 = vtanh.f32 %v1840_v39 }
0x17c6   :  { %v2601_v36 = vpop.eup %2600 }
0x17c7   :  { %v1843_v37 = vadd.f32 1.0, %v2601_v36 }
0x17c8   :  { %v2603_v38 = vpop.eup %2602 }
0x17c9   :  { %v1844_v45 = vadd.f32 1.0, %v2603_v38  ;;  %v1845_v46 = vmul.f32 %v1843_v37, %v1829_v41 }
0x17cb   :  { %v1846_v47 = vmul.f32 %v1844_v45, %v1830_v43 }
0x17cd   :  { %v1847_v49 = vpack.c.bf16 %v1846_v47, %v1845_v46 }
0x17cf   :  { %2496 = vmatmul.mubr.bf16.vlgmr.msra.gmra.mrb[40].mxu0 %v1847_v49 }
0x18a2   :  { %v1947_v50 = vpop.f32.mrb[40].mxu0 }
0x18a3   :  { %v1954_v9 = vadd.f32 %v1947_v50, %v3085_v40  ;;  %v2497_v53 = vpop.f32.mrb[41].mxu0 }
0x18a4   :  { %v1950_v54 = vpop.f32.mrb[42].mxu0 }
0x18a5   :  { %v1955_v12 = vadd.f32 %v1950_v54, %v3088_v44  ;;  %v2498_v55 = vpop.f32.mrb[43].mxu0  ;;  %v1964_v57 = vadd.f32 %v2227_v52, %v1954_v9 }
0x18a7   :  { %v1965_v58 = vadd.f32 %v2227_v52, %v1955_v12  ;;  %v1974_v60 = vsel %vm1973_vm13, %v1964_v57, 0.0 }
0x18a8   :  { %1975 = vadd.xlane.f32.xlu1 %v1974_v60 }
0x18a9   :  { %v1970_v61 = vrot.slane %v1965_v58, 7 }
0x18ab   :  { %v1978_v5 = vsel %vm1977_vm14, %v1970_v61, 0.0 }
0x18ac   :  { %1979 = vadd.xlane.f32.xlu0 %v1978_v5 }
0x1935   :  { %v1976_v62 = vpop.xlane.xlu1 %1975 }
0x1936   :  { %v1981_v63 = vmul.f32 0.03125, %v1976_v62 }
0x1938   :  { %v1988_v2 = vsub.f32 %v1964_v57, %v1981_v63 }
0x1939   :  { %v1980_v40 = vpop.xlane.xlu0 %1979 }
0x193a   :  { %v1982_v3 = vmul.f32 0.03125, %v1980_v40  ;;  %v1990_v0 = vmul.f32 %v1988_v2, %v1988_v2 }
0x193c   :  { %v1985_v4 = vrot.slane %v1982_v3, 1  ;;  %v1997_v44 = vsel %vm1973_vm13, %v1990_v0, 0.0 }
0x193d   :  { %1998 = vadd.xlane.f32.xlu1 %v1997_v44 }
0x193e   :  { %v1989_v6 = vsub.f32 %v1965_v58, %v1985_v4 }
0x1940   :  { %v1991_v1 = vmul.f32 %v1989_v6, %v1989_v6 }
0x1942   :  { %v1994_v8 = vrot.slane %v1991_v1, 7 }
0x1944   :  { %v2000_v10 = vsel %vm1977_vm14, %v1994_v8, 0.0 }
0x1945   :  { %2001 = vadd.xlane.f32.xlu0 %v2000_v10 }
0x19ca   :  { %v1999_v14 = vpop.xlane.xlu1 %1998 }
0x19cb   :  { %v2003_v16 = vmul.f32 0.03125, %v1999_v14 }
0x19cd   :  { %v2005_v7 = vadd.f32 1e-05, %v2003_v16 }
0x19cf   :  { %2604 = vrsqrt.f32 %v2005_v7 }
0x19d2   :  { %v2002_v17 = vpop.xlane.xlu0 %2001 }
0x19d3   :  { %v2004_v56 = vmul.f32 0.03125, %v2002_v17 }
0x19d5   :  { %v2006_v51 = vadd.f32 1e-05, %v2004_v56 }
0x19d7   :  { %2606 = vrsqrt.f32 %v2006_v51 }
0x19d9   :  { %v2605_v18 = vpop.eup %2604 }
0x19da   :  { %v2014_v19 = vmul.f32 %v2605_v18, %v1988_v2 }
0x19dc   :  { %v2022_v15 = vmul.f32 %v2228_v20, %v2014_v19 }
0x19de   :  { %v2030_v22 = vadd.f32 %v2229_v59, %v2022_v15 }
0x19e0   :  { %v2032_v24 = vpack.c.bf16 %v2030_v22, %v2030_v22 }
0x19e1   :  { %v2607_v21 = vpop.eup %2606 }
0x19e2   :  { %v2011_v48 = vrot.slane %v2607_v21, 1  ;;  %v2047_v27 = vunpack.c.l.b16 %v2032_v24 }
0x19e4   :  { %v2015_v23 = vmul.f32 %v2011_v48, %v1989_v6  ;;  %v2049_v42 = vrot.slane %v2047_v27, 7 }
0x19e6   :  { %v2023_v25 = vmul.f32 %v2228_v20, %v2015_v23 }
0x19e8   :  { %v2031_v26 = vadd.f32 %v2229_v59, %v2023_v25 }
0x19ea   :  { %v2033_v28 = vpack.c.bf16 %v2031_v26, %v2031_v26 }
0x19ec   :  { %v2048_v29 = vunpack.c.l.b16 %v2033_v28 }
0x19ee   :  { %v2050_v30 = vrot.slane %v2048_v29, 6 }
0x19f0   :  { %v2052_v31 = vsel %vm2051_vm15, %v2050_v30, %v2049_v42 }
0x19f1   :  { %v2053_v32 = vpack.c.b16 %v2052_v31, %v2052_v31 }
0x19f3   :  { %2504 = vmatmul.mubr.msk.bf16.vlgmr.msra.gmra.mrb[60].mxu1 %vm115_vm0, %v2053_v32 }
0x1ac6   :  { %v2103_v34 = vpop.f32.mrb[60].mxu1 }
0x1ac7   :  { %v2104_v35 = vadd.f32 %v2230_v33, %v2103_v34  ;;  %v2505_v39 = vpop.f32.mrb[61].mxu1 }
0x1ac8   :  { %v2106_v36 = vpop.f32.mrb[62].mxu1 }
0x1ac9   :  { %2109 = vst [vmem:[#allocation2] sm:$0x3] %v2104_v35  ;;  %v2506_v37 = vpop.f32.mrb[63].mxu1 }
0x1aca   :  { %2619 = shalt.err (!%p2616_p4)
}
0x1acb   :  { %s2620_s17 = scalar_lea.hbm %s3205_s18, 32 }
0x1acc   :  { %p2621_p5 = scmp.ne.s32.totalorder %s3205_s18, %s2620_s17  ;;  %p2624_p6 = scmp.lt.u32.totalorder %s2620_s17, %s3205_s18 }
0x1ace   :  { %p2626_p7 = pnand %p2624_p6, %p2621_p5 }
0x1ad0   :  { %2629 = shalt.err (!%p2626_p7)
}
0x1ad1   :  { %2119 = dma.vmem_to_hbm [thread:$0]  %s2117_s8, 32, %s3205_s18, [#allocation3]  }
0x1ad2   :  { %2630 = dma.done.wait [#allocation3], 32  }
0x1ad3   :  { %2631 = vsyncadd [#allocation3], 4294967264 }
0x1ad4   :  { %2123 = vsyncpa [#allocation3], 1 }

</bundles_post_ra>
